<compile_context>
chip_gen: v5e
topology: v5e:2x2
jax: 0.10.0
libtpu: 0.0.40
codegen_flags: <defaults>
</compile_context>

<pallas_src>
import functools

import jax
import jax.numpy as jnp
import numpy as np
from jax import lax
from jax.experimental import pallas as pl
from jax.experimental.pallas import tpu as pltpu

_LANE = 128  # output / batch-block granularity (lane width)


def _bf_loss_kernel(loc_ref, out_ref, *, N, M):
    """loc_ref: (D, P, Bb) f32, batch on lanes.  out_ref: (1, 1, Bb) f32."""
    D = loc_ref.shape[0]
    Bb = loc_ref.shape[2]

    # ---- squared pairwise distances on the VPU (no MXU, sqrt deferred) ----
    W2 = jnp.zeros((M, M, Bb), jnp.float32)   # UAV  j <-> UAV  k
    u2 = jnp.zeros((N, M, Bb), jnp.float32)   # user n  -> UAV  k  (source side)
    v2 = jnp.zeros((N, M, Bb), jnp.float32)   # user n+N -> UAV k  (dest side)
    for d in range(D):
        xd = loc_ref[d]                        # (P, Bb)
        ud = xd[2 * N:, :]                     # (M, Bb) UAV coords, dim d
        sd = xd[0:N, :]                        # (N, Bb) source users
        td = xd[N:2 * N, :]                    # (N, Bb) destination users
        dw = ud[:, None, :] - ud[None, :, :]   # (M, M, Bb)
        du = sd[:, None, :] - ud[None, :, :]   # (N, M, Bb)
        dt = td[:, None, :] - ud[None, :, :]   # (N, M, Bb)
        W2 = W2 + dw * dw
        u2 = u2 + du * du
        v2 = v2 + dt * dt

    # diag(W2) is exactly 0 by construction (x - x == 0 in IEEE); re-zero
    # defensively because the relaxation uses it as the "stay put" option.
    ri = lax.broadcasted_iota(jnp.int32, (M, M, Bb), 0)
    ci = lax.broadcasted_iota(jnp.int32, (M, M, Bb), 1)
    W2 = jnp.where(ri == ci, 0.0, W2)

    # ---- batched minimax Bellman-Ford on squared distances ----
    # dv[n, k, b] = best (squared) bottleneck user_n -> ... -> UAV_k so far.
    # M-1 sweeps cover every simple UAV path; diag(W2)==0 keeps old values.
    # min over j is unrolled into pairwise jnp.minimum (VALU, no XLU reduce).
    dv = u2
    for _ in range(M - 1):
        acc = jnp.maximum(dv[:, 0:1, :], W2[0:1, :, :])          # (N, M, Bb)
        for j in range(1, M):
            acc = jnp.minimum(acc, jnp.maximum(dv[:, j:j + 1, :],
                                               W2[j:j + 1, :, :]))
        dv = acc

    # Close each path with the UAV -> destination-user edge.
    closed = jnp.maximum(dv, v2)                                  # (N, M, Bb)
    b2 = closed[:, 0:1, :]
    for k in range(1, M):
        b2 = jnp.minimum(b2, closed[:, k:k + 1, :])               # (N, 1, Bb)

    bott = jnp.sqrt(b2)                       # only N*Bb sqrts (EUP)
    tot = bott[0]                             # (1, Bb)
    for n in range(1, N):
        tot = tot + bott[n]
    out_ref[0] = tot * (1.0 / N)              # lane-dense, unmasked store
    # TODO(synk): the torch module's explicit predecessor/path lists are not
    # materialized in-kernel; only the loss (mean bottleneck distance) is produced.


def bf_loss_batched(locations_batched, N, M, block_b=None):
    """Loss for a batch of candidate placements; Bb placements per grid step."""
    B, P, D = locations_batched.shape
    assert P == 2 * N + M, "locations must be (2N + M, coord_dim)"
    loc = locations_batched.astype(jnp.float32)

    if block_b is None:
        # Lane-dense batch blocks; grow the block (less fixed per-step overhead)
        # only while >= ~4 grid steps remain so v7x's two TensorCores both work.
        block_b = _LANE
        while block_b < 512 and B >= block_b * 4:
            block_b *= 2
    assert block_b % _LANE == 0

    G = max(1, (B + block_b - 1) // block_b)
    Bp = G * block_b
    if Bp != B:
        loc = jnp.pad(loc, ((0, Bp - B), (0, 0), (0, 0)))   # zero placements -> loss 0, sliced off
    loc_t = jnp.transpose(loc, (2, 1, 0))                    # (D, P, Bp): batch on lanes

    kernel = functools.partial(_bf_loss_kernel, N=N, M=M)
    out = pl.pallas_call(
        kernel,
        out_shape=jax.ShapeDtypeStruct((G, 1, block_b), jnp.float32),
        grid_spec=pltpu.PrefetchScalarGridSpec(
            num_scalar_prefetch=0,
            grid=(G,),
            in_specs=[pl.BlockSpec((D, P, block_b), lambda g: (0, 0, g))],
            out_specs=pl.BlockSpec((1, 1, block_b), lambda g: (g, 0, 0)),
        ),
        compiler_params=pltpu.CompilerParams(dimension_semantics=("parallel",)),
    )(loc_t)
    return out.reshape(-1)[:B]


def bf_loss(locations, N, M):
    """Pallas implementation of BFLoss(N, M).forward(locations)."""
    return bf_loss_batched(locations[None], N, M)[0]


# ------------- numpy reference: faithful port of PathSearch + BFLoss.forward -------------
def _bf_loss_reference(loc_np, N, M):
    loc = np.asarray(loc_np, dtype=np.float64)
    uav = loc[2 * N:]
    sum_sq_a = np.sum(uav ** 2, axis=1)[:, None]
    sum_sq_b = np.sum(loc ** 2, axis=1)[None, :]
    dist_mat = np.sqrt(np.abs(sum_sq_a + sum_sq_b - 2 * uav @ loc.T))   # (M, 2N+M)

    edge_src = np.concatenate([
        np.zeros(M, dtype=int),
        np.arange(2, M + 2),
        np.repeat(np.arange(2, M + 2), M),
    ])
    edge_dst = np.concatenate([
        np.arange(2, M + 2),
        np.full(M, 1, dtype=int),
        np.tile(np.arange(2, M + 2), M),
    ])

    path_list = []
    for i in range(N):
        uav_map = dist_mat[:, 2 * N:]
        uav_user = dist_mat[:, [i, i + N]]
        map_i = np.concatenate([uav_user, uav_map], axis=1)
        users_map = np.concatenate([np.zeros((2, 2)), uav_user.T], axis=1)
        map_i = np.concatenate([users_map, map_i], axis=0)

        max_edge = [np.inf] * (M + 2)
        max_edge[0] = 0.0
        max_edge_path = [[] for _ in range(M + 2)]
        max_edge_path[0] = [0]
        for _ in range(M + 2):
            for s, d in zip(edge_src, edge_dst):
                if s != d and max(max_edge[s], map_i[s][d]) < max_edge[d]:
                    max_edge[d] = max(max_edge[s], map_i[s][d])
                    max_edge_path[d] = max_edge_path[s].copy() + [d]
        path_list.append(np.array(max_edge_path[1]))

    best = []
    for i in range(N):
        p = path_list[i].copy()
        p[0] = i
        p[-1] = i + N
        p[1:-1] += 2 * (N - 1)
        uav_path = p[1:-1]
        dists = [np.linalg.norm(loc[p[0]] - loc[p[1]]),
                 np.linalg.norm(loc[p[-1]] - loc[p[-2]])]
        for j in range(len(uav_path) - 1):
            dists.append(np.linalg.norm(loc[uav_path[j]] - loc[uav_path[j + 1]]))
        best.append(max(dists))
    return float(np.mean(best))


if __name__ == "__main__":
    N, M, D = 3, 6, 3                          # 2N+M = 12 nodes, 3-D coordinates
    P = 2 * N + M

    # single placement
    key = jax.random.PRNGKey(0)
    locations = jax.random.uniform(key, (P, D), dtype=jnp.float32,
                                   minval=0.0, maxval=10.0)
    loss = jax.block_until_ready(bf_loss(locations, N, M))
    ref = _bf_loss_reference(np.asarray(locations), N, M)
    np.testing.assert_allclose(float(loss), ref, rtol=1e-4, atol=1e-4)

    # batched candidate placements (exercises lane padding inside one block)
    B = 5
    keys = jax.random.split(jax.random.PRNGKey(0), B)
    batch = jnp.stack([
        jax.random.uniform(k, (P, D), dtype=jnp.float32, minval=0.0, maxval=10.0)
        for k in keys
    ])
    losses = jax.block_until_ready(bf_loss_batched(batch, N, M))
    refs = np.array([_bf_loss_reference(np.asarray(batch[i]), N, M) for i in range(B)])
    np.testing.assert_allclose(np.asarray(losses), refs, rtol=1e-4, atol=1e-4)

    print("KERNEL_OK")
</pallas_src>

<mosaic_0001>
module attributes {stable_mosaic.version = 11 : i64} {
  func.func @_bf_loss_kernel(%arg0: i32, %arg1: memref<3x12x128xf32, #tpu.memory_space<vmem>>, %arg2: memref<1x1x128xf32, #tpu.memory_space<vmem>>) attributes {dimension_semantics = [#tpu.dimension_semantics<parallel>], iteration_bounds = array<i64: 1>, scalar_prefetch = 0 : i64, scratch_operands = 0 : i64, tpu.core_type = #tpu.core_type<tc>, window_params = [{transform_indices = @transform_0, window_bounds = array<i64: 3, 12, 128>}, {transform_indices = @transform_1, window_bounds = array<i64: 1, 1, 128>}]} {
    %cst = arith.constant 0.000000e+00 : f32
    %0 = vector.broadcast %cst : f32 to vector<6x6x128xf32>
    %cst_0 = arith.constant 0.000000e+00 : f32
    %1 = vector.broadcast %cst_0 : f32 to vector<3x6x128xf32>
    %cst_1 = arith.constant 0.000000e+00 : f32
    %2 = vector.broadcast %cst_1 : f32 to vector<3x6x128xf32>
    %c0 = arith.constant 0 : index
    %c0_2 = arith.constant 0 : index
    %c0_3 = arith.constant 0 : index
    %3 = vector.load %arg1[%c0, %c0_2, %c0_3] : memref<3x12x128xf32, #tpu.memory_space<vmem>>, vector<1x12x128xf32>
    %4 = vector.shape_cast %3 : vector<1x12x128xf32> to vector<12x128xf32>
    %5 = vector.extract_strided_slice %4 {offsets = [6, 0], sizes = [6, 128], strides = [1, 1]} : vector<12x128xf32> to vector<6x128xf32>
    %6 = vector.extract_strided_slice %4 {offsets = [0, 0], sizes = [3, 128], strides = [1, 1]} : vector<12x128xf32> to vector<3x128xf32>
    %7 = vector.extract_strided_slice %4 {offsets = [3, 0], sizes = [3, 128], strides = [1, 1]} : vector<12x128xf32> to vector<3x128xf32>
    %8 = vector.shape_cast %5 : vector<6x128xf32> to vector<6x1x128xf32>
    %9 = vector.shape_cast %5 : vector<6x128xf32> to vector<1x6x128xf32>
    %10 = vector.broadcast %8 : vector<6x1x128xf32> to vector<6x6x128xf32>
    %11 = vector.broadcast %9 : vector<1x6x128xf32> to vector<6x6x128xf32>
    %12 = arith.subf %10, %11 : vector<6x6x128xf32>
    %13 = vector.shape_cast %6 : vector<3x128xf32> to vector<3x1x128xf32>
    %14 = vector.shape_cast %5 : vector<6x128xf32> to vector<1x6x128xf32>
    %15 = vector.broadcast %13 : vector<3x1x128xf32> to vector<3x6x128xf32>
    %16 = vector.broadcast %14 : vector<1x6x128xf32> to vector<3x6x128xf32>
    %17 = arith.subf %15, %16 : vector<3x6x128xf32>
    %18 = vector.shape_cast %7 : vector<3x128xf32> to vector<3x1x128xf32>
    %19 = vector.shape_cast %5 : vector<6x128xf32> to vector<1x6x128xf32>
    %20 = vector.broadcast %18 : vector<3x1x128xf32> to vector<3x6x128xf32>
    %21 = vector.broadcast %19 : vector<1x6x128xf32> to vector<3x6x128xf32>
    %22 = arith.subf %20, %21 : vector<3x6x128xf32>
    %23 = arith.mulf %12, %12 : vector<6x6x128xf32>
    %24 = arith.addf %0, %23 : vector<6x6x128xf32>
    %25 = arith.mulf %17, %17 : vector<3x6x128xf32>
    %26 = arith.addf %1, %25 : vector<3x6x128xf32>
    %27 = arith.mulf %22, %22 : vector<3x6x128xf32>
    %28 = arith.addf %2, %27 : vector<3x6x128xf32>
    %c1 = arith.constant 1 : index
    %c0_4 = arith.constant 0 : index
    %c0_5 = arith.constant 0 : index
    %29 = vector.load %arg1[%c1, %c0_4, %c0_5] : memref<3x12x128xf32, #tpu.memory_space<vmem>>, vector<1x12x128xf32>
    %30 = vector.shape_cast %29 : vector<1x12x128xf32> to vector<12x128xf32>
    %31 = vector.extract_strided_slice %30 {offsets = [6, 0], sizes = [6, 128], strides = [1, 1]} : vector<12x128xf32> to vector<6x128xf32>
    %32 = vector.extract_strided_slice %30 {offsets = [0, 0], sizes = [3, 128], strides = [1, 1]} : vector<12x128xf32> to vector<3x128xf32>
    %33 = vector.extract_strided_slice %30 {offsets = [3, 0], sizes = [3, 128], strides = [1, 1]} : vector<12x128xf32> to vector<3x128xf32>
    %34 = vector.shape_cast %31 : vector<6x128xf32> to vector<6x1x128xf32>
    %35 = vector.shape_cast %31 : vector<6x128xf32> to vector<1x6x128xf32>
    %36 = vector.broadcast %34 : vector<6x1x128xf32> to vector<6x6x128xf32>
    %37 = vector.broadcast %35 : vector<1x6x128xf32> to vector<6x6x128xf32>
    %38 = arith.subf %36, %37 : vector<6x6x128xf32>
    %39 = vector.shape_cast %32 : vector<3x128xf32> to vector<3x1x128xf32>
    %40 = vector.shape_cast %31 : vector<6x128xf32> to vector<1x6x128xf32>
    %41 = vector.broadcast %39 : vector<3x1x128xf32> to vector<3x6x128xf32>
    %42 = vector.broadcast %40 : vector<1x6x128xf32> to vector<3x6x128xf32>
    %43 = arith.subf %41, %42 : vector<3x6x128xf32>
    %44 = vector.shape_cast %33 : vector<3x128xf32> to vector<3x1x128xf32>
    %45 = vector.shape_cast %31 : vector<6x128xf32> to vector<1x6x128xf32>
    %46 = vector.broadcast %44 : vector<3x1x128xf32> to vector<3x6x128xf32>
    %47 = vector.broadcast %45 : vector<1x6x128xf32> to vector<3x6x128xf32>
    %48 = arith.subf %46, %47 : vector<3x6x128xf32>
    %49 = arith.mulf %38, %38 : vector<6x6x128xf32>
    %50 = arith.addf %24, %49 : vector<6x6x128xf32>
    %51 = arith.mulf %43, %43 : vector<3x6x128xf32>
    %52 = arith.addf %26, %51 : vector<3x6x128xf32>
    %53 = arith.mulf %48, %48 : vector<3x6x128xf32>
    %54 = arith.addf %28, %53 : vector<3x6x128xf32>
    %c2 = arith.constant 2 : index
    %c0_6 = arith.constant 0 : index
    %c0_7 = arith.constant 0 : index
    %55 = vector.load %arg1[%c2, %c0_6, %c0_7] : memref<3x12x128xf32, #tpu.memory_space<vmem>>, vector<1x12x128xf32>
    %56 = vector.shape_cast %55 : vector<1x12x128xf32> to vector<12x128xf32>
    %57 = vector.extract_strided_slice %56 {offsets = [6, 0], sizes = [6, 128], strides = [1, 1]} : vector<12x128xf32> to vector<6x128xf32>
    %58 = vector.extract_strided_slice %56 {offsets = [0, 0], sizes = [3, 128], strides = [1, 1]} : vector<12x128xf32> to vector<3x128xf32>
    %59 = vector.extract_strided_slice %56 {offsets = [3, 0], sizes = [3, 128], strides = [1, 1]} : vector<12x128xf32> to vector<3x128xf32>
    %60 = vector.shape_cast %57 : vector<6x128xf32> to vector<6x1x128xf32>
    %61 = vector.shape_cast %57 : vector<6x128xf32> to vector<1x6x128xf32>
    %62 = vector.broadcast %60 : vector<6x1x128xf32> to vector<6x6x128xf32>
    %63 = vector.broadcast %61 : vector<1x6x128xf32> to vector<6x6x128xf32>
    %64 = arith.subf %62, %63 : vector<6x6x128xf32>
    %65 = vector.shape_cast %58 : vector<3x128xf32> to vector<3x1x128xf32>
    %66 = vector.shape_cast %57 : vector<6x128xf32> to vector<1x6x128xf32>
    %67 = vector.broadcast %65 : vector<3x1x128xf32> to vector<3x6x128xf32>
    %68 = vector.broadcast %66 : vector<1x6x128xf32> to vector<3x6x128xf32>
    %69 = arith.subf %67, %68 : vector<3x6x128xf32>
    %70 = vector.shape_cast %59 : vector<3x128xf32> to vector<3x1x128xf32>
    %71 = vector.shape_cast %57 : vector<6x128xf32> to vector<1x6x128xf32>
    %72 = vector.broadcast %70 : vector<3x1x128xf32> to vector<3x6x128xf32>
    %73 = vector.broadcast %71 : vector<1x6x128xf32> to vector<3x6x128xf32>
    %74 = arith.subf %72, %73 : vector<3x6x128xf32>
    %75 = arith.mulf %64, %64 : vector<6x6x128xf32>
    %76 = arith.addf %50, %75 : vector<6x6x128xf32>
    %77 = arith.mulf %69, %69 : vector<3x6x128xf32>
    %78 = arith.addf %52, %77 : vector<3x6x128xf32>
    %79 = arith.mulf %74, %74 : vector<3x6x128xf32>
    %80 = arith.addf %54, %79 : vector<3x6x128xf32>
    %81 = tpu.iota {dimensions = array<i32: 0>} : vector<6x6x128xi32>
    %82 = tpu.iota {dimensions = array<i32: 1>} : vector<6x6x128xi32>
    %83 = arith.cmpi eq, %81, %82 : vector<6x6x128xi32>
    %cst_8 = arith.constant 0.000000e+00 : f32
    %84 = vector.broadcast %cst_8 : f32 to vector<6x6x128xf32>
    %85 = arith.select %83, %84, %76 : vector<6x6x128xi1>, vector<6x6x128xf32>
    %86 = vector.extract_strided_slice %78 {offsets = [0, 0, 0], sizes = [3, 1, 128], strides = [1, 1, 1]} : vector<3x6x128xf32> to vector<3x1x128xf32>
    %87 = vector.extract_strided_slice %85 {offsets = [0, 0, 0], sizes = [1, 6, 128], strides = [1, 1, 1]} : vector<6x6x128xf32> to vector<1x6x128xf32>
    %88 = vector.broadcast %86 : vector<3x1x128xf32> to vector<3x6x128xf32>
    %89 = vector.broadcast %87 : vector<1x6x128xf32> to vector<3x6x128xf32>
    %90 = arith.maximumf %88, %89 : vector<3x6x128xf32>
    %91 = vector.extract_strided_slice %78 {offsets = [0, 1, 0], sizes = [3, 1, 128], strides = [1, 1, 1]} : vector<3x6x128xf32> to vector<3x1x128xf32>
    %92 = vector.extract_strided_slice %85 {offsets = [1, 0, 0], sizes = [1, 6, 128], strides = [1, 1, 1]} : vector<6x6x128xf32> to vector<1x6x128xf32>
    %93 = vector.broadcast %91 : vector<3x1x128xf32> to vector<3x6x128xf32>
    %94 = vector.broadcast %92 : vector<1x6x128xf32> to vector<3x6x128xf32>
    %95 = arith.maximumf %93, %94 : vector<3x6x128xf32>
    %96 = arith.minimumf %90, %95 : vector<3x6x128xf32>
    %97 = vector.extract_strided_slice %78 {offsets = [0, 2, 0], sizes = [3, 1, 128], strides = [1, 1, 1]} : vector<3x6x128xf32> to vector<3x1x128xf32>
    %98 = vector.extract_strided_slice %85 {offsets = [2, 0, 0], sizes = [1, 6, 128], strides = [1, 1, 1]} : vector<6x6x128xf32> to vector<1x6x128xf32>
    %99 = vector.broadcast %97 : vector<3x1x128xf32> to vector<3x6x128xf32>
    %100 = vector.broadcast %98 : vector<1x6x128xf32> to vector<3x6x128xf32>
    %101 = arith.maximumf %99, %100 : vector<3x6x128xf32>
    %102 = arith.minimumf %96, %101 : vector<3x6x128xf32>
    %103 = vector.extract_strided_slice %78 {offsets = [0, 3, 0], sizes = [3, 1, 128], strides = [1, 1, 1]} : vector<3x6x128xf32> to vector<3x1x128xf32>
    %104 = vector.extract_strided_slice %85 {offsets = [3, 0, 0], sizes = [1, 6, 128], strides = [1, 1, 1]} : vector<6x6x128xf32> to vector<1x6x128xf32>
    %105 = vector.broadcast %103 : vector<3x1x128xf32> to vector<3x6x128xf32>
    %106 = vector.broadcast %104 : vector<1x6x128xf32> to vector<3x6x128xf32>
    %107 = arith.maximumf %105, %106 : vector<3x6x128xf32>
    %108 = arith.minimumf %102, %107 : vector<3x6x128xf32>
    %109 = vector.extract_strided_slice %78 {offsets = [0, 4, 0], sizes = [3, 1, 128], strides = [1, 1, 1]} : vector<3x6x128xf32> to vector<3x1x128xf32>
    %110 = vector.extract_strided_slice %85 {offsets = [4, 0, 0], sizes = [1, 6, 128], strides = [1, 1, 1]} : vector<6x6x128xf32> to vector<1x6x128xf32>
    %111 = vector.broadcast %109 : vector<3x1x128xf32> to vector<3x6x128xf32>
    %112 = vector.broadcast %110 : vector<1x6x128xf32> to vector<3x6x128xf32>
    %113 = arith.maximumf %111, %112 : vector<3x6x128xf32>
    %114 = arith.minimumf %108, %113 : vector<3x6x128xf32>
    %115 = vector.extract_strided_slice %78 {offsets = [0, 5, 0], sizes = [3, 1, 128], strides = [1, 1, 1]} : vector<3x6x128xf32> to vector<3x1x128xf32>
    %116 = vector.extract_strided_slice %85 {offsets = [5, 0, 0], sizes = [1, 6, 128], strides = [1, 1, 1]} : vector<6x6x128xf32> to vector<1x6x128xf32>
    %117 = vector.broadcast %115 : vector<3x1x128xf32> to vector<3x6x128xf32>
    %118 = vector.broadcast %116 : vector<1x6x128xf32> to vector<3x6x128xf32>
    %119 = arith.maximumf %117, %118 : vector<3x6x128xf32>
    %120 = arith.minimumf %114, %119 : vector<3x6x128xf32>
    %121 = vector.extract_strided_slice %120 {offsets = [0, 0, 0], sizes = [3, 1, 128], strides = [1, 1, 1]} : vector<3x6x128xf32> to vector<3x1x128xf32>
    %122 = vector.extract_strided_slice %85 {offsets = [0, 0, 0], sizes = [1, 6, 128], strides = [1, 1, 1]} : vector<6x6x128xf32> to vector<1x6x128xf32>
    %123 = vector.broadcast %121 : vector<3x1x128xf32> to vector<3x6x128xf32>
    %124 = vector.broadcast %122 : vector<1x6x128xf32> to vector<3x6x128xf32>
    %125 = arith.maximumf %123, %124 : vector<3x6x128xf32>
    %126 = vector.extract_strided_slice %120 {offsets = [0, 1, 0], sizes = [3, 1, 128], strides = [1, 1, 1]} : vector<3x6x128xf32> to vector<3x1x128xf32>
    %127 = vector.extract_strided_slice %85 {offsets = [1, 0, 0], sizes = [1, 6, 128], strides = [1, 1, 1]} : vector<6x6x128xf32> to vector<1x6x128xf32>
    %128 = vector.broadcast %126 : vector<3x1x128xf32> to vector<3x6x128xf32>
    %129 = vector.broadcast %127 : vector<1x6x128xf32> to vector<3x6x128xf32>
    %130 = arith.maximumf %128, %129 : vector<3x6x128xf32>
    %131 = arith.minimumf %125, %130 : vector<3x6x128xf32>
    %132 = vector.extract_strided_slice %120 {offsets = [0, 2, 0], sizes = [3, 1, 128], strides = [1, 1, 1]} : vector<3x6x128xf32> to vector<3x1x128xf32>
    %133 = vector.extract_strided_slice %85 {offsets = [2, 0, 0], sizes = [1, 6, 128], strides = [1, 1, 1]} : vector<6x6x128xf32> to vector<1x6x128xf32>
    %134 = vector.broadcast %132 : vector<3x1x128xf32> to vector<3x6x128xf32>
    %135 = vector.broadcast %133 : vector<1x6x128xf32> to vector<3x6x128xf32>
    %136 = arith.maximumf %134, %135 : vector<3x6x128xf32>
    %137 = arith.minimumf %131, %136 : vector<3x6x128xf32>
    %138 = vector.extract_strided_slice %120 {offsets = [0, 3, 0], sizes = [3, 1, 128], strides = [1, 1, 1]} : vector<3x6x128xf32> to vector<3x1x128xf32>
    %139 = vector.extract_strided_slice %85 {offsets = [3, 0, 0], sizes = [1, 6, 128], strides = [1, 1, 1]} : vector<6x6x128xf32> to vector<1x6x128xf32>
    %140 = vector.broadcast %138 : vector<3x1x128xf32> to vector<3x6x128xf32>
    %141 = vector.broadcast %139 : vector<1x6x128xf32> to vector<3x6x128xf32>
    %142 = arith.maximumf %140, %141 : vector<3x6x128xf32>
    %143 = arith.minimumf %137, %142 : vector<3x6x128xf32>
    %144 = vector.extract_strided_slice %120 {offsets = [0, 4, 0], sizes = [3, 1, 128], strides = [1, 1, 1]} : vector<3x6x128xf32> to vector<3x1x128xf32>
    %145 = vector.extract_strided_slice %85 {offsets = [4, 0, 0], sizes = [1, 6, 128], strides = [1, 1, 1]} : vector<6x6x128xf32> to vector<1x6x128xf32>
    %146 = vector.broadcast %144 : vector<3x1x128xf32> to vector<3x6x128xf32>
    %147 = vector.broadcast %145 : vector<1x6x128xf32> to vector<3x6x128xf32>
    %148 = arith.maximumf %146, %147 : vector<3x6x128xf32>
    %149 = arith.minimumf %143, %148 : vector<3x6x128xf32>
    %150 = vector.extract_strided_slice %120 {offsets = [0, 5, 0], sizes = [3, 1, 128], strides = [1, 1, 1]} : vector<3x6x128xf32> to vector<3x1x128xf32>
    %151 = vector.extract_strided_slice %85 {offsets = [5, 0, 0], sizes = [1, 6, 128], strides = [1, 1, 1]} : vector<6x6x128xf32> to vector<1x6x128xf32>
    %152 = vector.broadcast %150 : vector<3x1x128xf32> to vector<3x6x128xf32>
    %153 = vector.broadcast %151 : vector<1x6x128xf32> to vector<3x6x128xf32>
    %154 = arith.maximumf %152, %153 : vector<3x6x128xf32>
    %155 = arith.minimumf %149, %154 : vector<3x6x128xf32>
    %156 = vector.extract_strided_slice %155 {offsets = [0, 0, 0], sizes = [3, 1, 128], strides = [1, 1, 1]} : vector<3x6x128xf32> to vector<3x1x128xf32>
    %157 = vector.extract_strided_slice %85 {offsets = [0, 0, 0], sizes = [1, 6, 128], strides = [1, 1, 1]} : vector<6x6x128xf32> to vector<1x6x128xf32>
    %158 = vector.broadcast %156 : vector<3x1x128xf32> to vector<3x6x128xf32>
    %159 = vector.broadcast %157 : vector<1x6x128xf32> to vector<3x6x128xf32>
    %160 = arith.maximumf %158, %159 : vector<3x6x128xf32>
    %161 = vector.extract_strided_slice %155 {offsets = [0, 1, 0], sizes = [3, 1, 128], strides = [1, 1, 1]} : vector<3x6x128xf32> to vector<3x1x128xf32>
    %162 = vector.extract_strided_slice %85 {offsets = [1, 0, 0], sizes = [1, 6, 128], strides = [1, 1, 1]} : vector<6x6x128xf32> to vector<1x6x128xf32>
    %163 = vector.broadcast %161 : vector<3x1x128xf32> to vector<3x6x128xf32>
    %164 = vector.broadcast %162 : vector<1x6x128xf32> to vector<3x6x128xf32>
    %165 = arith.maximumf %163, %164 : vector<3x6x128xf32>
    %166 = arith.minimumf %160, %165 : vector<3x6x128xf32>
    %167 = vector.extract_strided_slice %155 {offsets = [0, 2, 0], sizes = [3, 1, 128], strides = [1, 1, 1]} : vector<3x6x128xf32> to vector<3x1x128xf32>
    %168 = vector.extract_strided_slice %85 {offsets = [2, 0, 0], sizes = [1, 6, 128], strides = [1, 1, 1]} : vector<6x6x128xf32> to vector<1x6x128xf32>
    %169 = vector.broadcast %167 : vector<3x1x128xf32> to vector<3x6x128xf32>
    %170 = vector.broadcast %168 : vector<1x6x128xf32> to vector<3x6x128xf32>
    %171 = arith.maximumf %169, %170 : vector<3x6x128xf32>
    %172 = arith.minimumf %166, %171 : vector<3x6x128xf32>
    %173 = vector.extract_strided_slice %155 {offsets = [0, 3, 0], sizes = [3, 1, 128], strides = [1, 1, 1]} : vector<3x6x128xf32> to vector<3x1x128xf32>
    %174 = vector.extract_strided_slice %85 {offsets = [3, 0, 0], sizes = [1, 6, 128], strides = [1, 1, 1]} : vector<6x6x128xf32> to vector<1x6x128xf32>
    %175 = vector.broadcast %173 : vector<3x1x128xf32> to vector<3x6x128xf32>
    %176 = vector.broadcast %174 : vector<1x6x128xf32> to vector<3x6x128xf32>
    %177 = arith.maximumf %175, %176 : vector<3x6x128xf32>
    %178 = arith.minimumf %172, %177 : vector<3x6x128xf32>
    %179 = vector.extract_strided_slice %155 {offsets = [0, 4, 0], sizes = [3, 1, 128], strides = [1, 1, 1]} : vector<3x6x128xf32> to vector<3x1x128xf32>
    %180 = vector.extract_strided_slice %85 {offsets = [4, 0, 0], sizes = [1, 6, 128], strides = [1, 1, 1]} : vector<6x6x128xf32> to vector<1x6x128xf32>
    %181 = vector.broadcast %179 : vector<3x1x128xf32> to vector<3x6x128xf32>
    %182 = vector.broadcast %180 : vector<1x6x128xf32> to vector<3x6x128xf32>
    %183 = arith.maximumf %181, %182 : vector<3x6x128xf32>
    %184 = arith.minimumf %178, %183 : vector<3x6x128xf32>
    %185 = vector.extract_strided_slice %155 {offsets = [0, 5, 0], sizes = [3, 1, 128], strides = [1, 1, 1]} : vector<3x6x128xf32> to vector<3x1x128xf32>
    %186 = vector.extract_strided_slice %85 {offsets = [5, 0, 0], sizes = [1, 6, 128], strides = [1, 1, 1]} : vector<6x6x128xf32> to vector<1x6x128xf32>
    %187 = vector.broadcast %185 : vector<3x1x128xf32> to vector<3x6x128xf32>
    %188 = vector.broadcast %186 : vector<1x6x128xf32> to vector<3x6x128xf32>
    %189 = arith.maximumf %187, %188 : vector<3x6x128xf32>
    %190 = arith.minimumf %184, %189 : vector<3x6x128xf32>
    %191 = vector.extract_strided_slice %190 {offsets = [0, 0, 0], sizes = [3, 1, 128], strides = [1, 1, 1]} : vector<3x6x128xf32> to vector<3x1x128xf32>
    %192 = vector.extract_strided_slice %85 {offsets = [0, 0, 0], sizes = [1, 6, 128], strides = [1, 1, 1]} : vector<6x6x128xf32> to vector<1x6x128xf32>
    %193 = vector.broadcast %191 : vector<3x1x128xf32> to vector<3x6x128xf32>
    %194 = vector.broadcast %192 : vector<1x6x128xf32> to vector<3x6x128xf32>
    %195 = arith.maximumf %193, %194 : vector<3x6x128xf32>
    %196 = vector.extract_strided_slice %190 {offsets = [0, 1, 0], sizes = [3, 1, 128], strides = [1, 1, 1]} : vector<3x6x128xf32> to vector<3x1x128xf32>
    %197 = vector.extract_strided_slice %85 {offsets = [1, 0, 0], sizes = [1, 6, 128], strides = [1, 1, 1]} : vector<6x6x128xf32> to vector<1x6x128xf32>
    %198 = vector.broadcast %196 : vector<3x1x128xf32> to vector<3x6x128xf32>
    %199 = vector.broadcast %197 : vector<1x6x128xf32> to vector<3x6x128xf32>
    %200 = arith.maximumf %198, %199 : vector<3x6x128xf32>
    %201 = arith.minimumf %195, %200 : vector<3x6x128xf32>
    %202 = vector.extract_strided_slice %190 {offsets = [0, 2, 0], sizes = [3, 1, 128], strides = [1, 1, 1]} : vector<3x6x128xf32> to vector<3x1x128xf32>
    %203 = vector.extract_strided_slice %85 {offsets = [2, 0, 0], sizes = [1, 6, 128], strides = [1, 1, 1]} : vector<6x6x128xf32> to vector<1x6x128xf32>
    %204 = vector.broadcast %202 : vector<3x1x128xf32> to vector<3x6x128xf32>
    %205 = vector.broadcast %203 : vector<1x6x128xf32> to vector<3x6x128xf32>
    %206 = arith.maximumf %204, %205 : vector<3x6x128xf32>
    %207 = arith.minimumf %201, %206 : vector<3x6x128xf32>
    %208 = vector.extract_strided_slice %190 {offsets = [0, 3, 0], sizes = [3, 1, 128], strides = [1, 1, 1]} : vector<3x6x128xf32> to vector<3x1x128xf32>
    %209 = vector.extract_strided_slice %85 {offsets = [3, 0, 0], sizes = [1, 6, 128], strides = [1, 1, 1]} : vector<6x6x128xf32> to vector<1x6x128xf32>
    %210 = vector.broadcast %208 : vector<3x1x128xf32> to vector<3x6x128xf32>
    %211 = vector.broadcast %209 : vector<1x6x128xf32> to vector<3x6x128xf32>
    %212 = arith.maximumf %210, %211 : vector<3x6x128xf32>
    %213 = arith.minimumf %207, %212 : vector<3x6x128xf32>
    %214 = vector.extract_strided_slice %190 {offsets = [0, 4, 0], sizes = [3, 1, 128], strides = [1, 1, 1]} : vector<3x6x128xf32> to vector<3x1x128xf32>
    %215 = vector.extract_strided_slice %85 {offsets = [4, 0, 0], sizes = [1, 6, 128], strides = [1, 1, 1]} : vector<6x6x128xf32> to vector<1x6x128xf32>
    %216 = vector.broadcast %214 : vector<3x1x128xf32> to vector<3x6x128xf32>
    %217 = vector.broadcast %215 : vector<1x6x128xf32> to vector<3x6x128xf32>
    %218 = arith.maximumf %216, %217 : vector<3x6x128xf32>
    %219 = arith.minimumf %213, %218 : vector<3x6x128xf32>
    %220 = vector.extract_strided_slice %190 {offsets = [0, 5, 0], sizes = [3, 1, 128], strides = [1, 1, 1]} : vector<3x6x128xf32> to vector<3x1x128xf32>
    %221 = vector.extract_strided_slice %85 {offsets = [5, 0, 0], sizes = [1, 6, 128], strides = [1, 1, 1]} : vector<6x6x128xf32> to vector<1x6x128xf32>
    %222 = vector.broadcast %220 : vector<3x1x128xf32> to vector<3x6x128xf32>
    %223 = vector.broadcast %221 : vector<1x6x128xf32> to vector<3x6x128xf32>
    %224 = arith.maximumf %222, %223 : vector<3x6x128xf32>
    %225 = arith.minimumf %219, %224 : vector<3x6x128xf32>
    %226 = vector.extract_strided_slice %225 {offsets = [0, 0, 0], sizes = [3, 1, 128], strides = [1, 1, 1]} : vector<3x6x128xf32> to vector<3x1x128xf32>
    %227 = vector.extract_strided_slice %85 {offsets = [0, 0, 0], sizes = [1, 6, 128], strides = [1, 1, 1]} : vector<6x6x128xf32> to vector<1x6x128xf32>
    %228 = vector.broadcast %226 : vector<3x1x128xf32> to vector<3x6x128xf32>
    %229 = vector.broadcast %227 : vector<1x6x128xf32> to vector<3x6x128xf32>
    %230 = arith.maximumf %228, %229 : vector<3x6x128xf32>
    %231 = vector.extract_strided_slice %225 {offsets = [0, 1, 0], sizes = [3, 1, 128], strides = [1, 1, 1]} : vector<3x6x128xf32> to vector<3x1x128xf32>
    %232 = vector.extract_strided_slice %85 {offsets = [1, 0, 0], sizes = [1, 6, 128], strides = [1, 1, 1]} : vector<6x6x128xf32> to vector<1x6x128xf32>
    %233 = vector.broadcast %231 : vector<3x1x128xf32> to vector<3x6x128xf32>
    %234 = vector.broadcast %232 : vector<1x6x128xf32> to vector<3x6x128xf32>
    %235 = arith.maximumf %233, %234 : vector<3x6x128xf32>
    %236 = arith.minimumf %230, %235 : vector<3x6x128xf32>
    %237 = vector.extract_strided_slice %225 {offsets = [0, 2, 0], sizes = [3, 1, 128], strides = [1, 1, 1]} : vector<3x6x128xf32> to vector<3x1x128xf32>
    %238 = vector.extract_strided_slice %85 {offsets = [2, 0, 0], sizes = [1, 6, 128], strides = [1, 1, 1]} : vector<6x6x128xf32> to vector<1x6x128xf32>
    %239 = vector.broadcast %237 : vector<3x1x128xf32> to vector<3x6x128xf32>
    %240 = vector.broadcast %238 : vector<1x6x128xf32> to vector<3x6x128xf32>
    %241 = arith.maximumf %239, %240 : vector<3x6x128xf32>
    %242 = arith.minimumf %236, %241 : vector<3x6x128xf32>
    %243 = vector.extract_strided_slice %225 {offsets = [0, 3, 0], sizes = [3, 1, 128], strides = [1, 1, 1]} : vector<3x6x128xf32> to vector<3x1x128xf32>
    %244 = vector.extract_strided_slice %85 {offsets = [3, 0, 0], sizes = [1, 6, 128], strides = [1, 1, 1]} : vector<6x6x128xf32> to vector<1x6x128xf32>
    %245 = vector.broadcast %243 : vector<3x1x128xf32> to vector<3x6x128xf32>
    %246 = vector.broadcast %244 : vector<1x6x128xf32> to vector<3x6x128xf32>
    %247 = arith.maximumf %245, %246 : vector<3x6x128xf32>
    %248 = arith.minimumf %242, %247 : vector<3x6x128xf32>
    %249 = vector.extract_strided_slice %225 {offsets = [0, 4, 0], sizes = [3, 1, 128], strides = [1, 1, 1]} : vector<3x6x128xf32> to vector<3x1x128xf32>
    %250 = vector.extract_strided_slice %85 {offsets = [4, 0, 0], sizes = [1, 6, 128], strides = [1, 1, 1]} : vector<6x6x128xf32> to vector<1x6x128xf32>
    %251 = vector.broadcast %249 : vector<3x1x128xf32> to vector<3x6x128xf32>
    %252 = vector.broadcast %250 : vector<1x6x128xf32> to vector<3x6x128xf32>
    %253 = arith.maximumf %251, %252 : vector<3x6x128xf32>
    %254 = arith.minimumf %248, %253 : vector<3x6x128xf32>
    %255 = vector.extract_strided_slice %225 {offsets = [0, 5, 0], sizes = [3, 1, 128], strides = [1, 1, 1]} : vector<3x6x128xf32> to vector<3x1x128xf32>
    %256 = vector.extract_strided_slice %85 {offsets = [5, 0, 0], sizes = [1, 6, 128], strides = [1, 1, 1]} : vector<6x6x128xf32> to vector<1x6x128xf32>
    %257 = vector.broadcast %255 : vector<3x1x128xf32> to vector<3x6x128xf32>
    %258 = vector.broadcast %256 : vector<1x6x128xf32> to vector<3x6x128xf32>
    %259 = arith.maximumf %257, %258 : vector<3x6x128xf32>
    %260 = arith.minimumf %254, %259 : vector<3x6x128xf32>
    %261 = arith.maximumf %260, %80 : vector<3x6x128xf32>
    %262 = vector.extract_strided_slice %261 {offsets = [0, 0, 0], sizes = [3, 1, 128], strides = [1, 1, 1]} : vector<3x6x128xf32> to vector<3x1x128xf32>
    %263 = vector.extract_strided_slice %261 {offsets = [0, 1, 0], sizes = [3, 1, 128], strides = [1, 1, 1]} : vector<3x6x128xf32> to vector<3x1x128xf32>
    %264 = arith.minimumf %262, %263 : vector<3x1x128xf32>
    %265 = vector.extract_strided_slice %261 {offsets = [0, 2, 0], sizes = [3, 1, 128], strides = [1, 1, 1]} : vector<3x6x128xf32> to vector<3x1x128xf32>
    %266 = arith.minimumf %264, %265 : vector<3x1x128xf32>
    %267 = vector.extract_strided_slice %261 {offsets = [0, 3, 0], sizes = [3, 1, 128], strides = [1, 1, 1]} : vector<3x6x128xf32> to vector<3x1x128xf32>
    %268 = arith.minimumf %266, %267 : vector<3x1x128xf32>
    %269 = vector.extract_strided_slice %261 {offsets = [0, 4, 0], sizes = [3, 1, 128], strides = [1, 1, 1]} : vector<3x6x128xf32> to vector<3x1x128xf32>
    %270 = arith.minimumf %268, %269 : vector<3x1x128xf32>
    %271 = vector.extract_strided_slice %261 {offsets = [0, 5, 0], sizes = [3, 1, 128], strides = [1, 1, 1]} : vector<3x6x128xf32> to vector<3x1x128xf32>
    %272 = arith.minimumf %270, %271 : vector<3x1x128xf32>
    %273 = math.sqrt %272 : vector<3x1x128xf32>
    %274 = vector.extract_strided_slice %273 {offsets = [0, 0, 0], sizes = [1, 1, 128], strides = [1, 1, 1]} : vector<3x1x128xf32> to vector<1x1x128xf32>
    %275 = vector.shape_cast %274 : vector<1x1x128xf32> to vector<1x128xf32>
    %276 = vector.extract_strided_slice %273 {offsets = [1, 0, 0], sizes = [1, 1, 128], strides = [1, 1, 1]} : vector<3x1x128xf32> to vector<1x1x128xf32>
    %277 = vector.shape_cast %276 : vector<1x1x128xf32> to vector<1x128xf32>
    %278 = arith.addf %275, %277 : vector<1x128xf32>
    %279 = vector.extract_strided_slice %273 {offsets = [2, 0, 0], sizes = [1, 1, 128], strides = [1, 1, 1]} : vector<3x1x128xf32> to vector<1x1x128xf32>
    %280 = vector.shape_cast %279 : vector<1x1x128xf32> to vector<1x128xf32>
    %281 = arith.addf %278, %280 : vector<1x128xf32>
    %cst_9 = arith.constant 0.333333343 : f32
    %282 = vector.broadcast %cst_9 : f32 to vector<1x128xf32>
    %283 = arith.mulf %281, %282 : vector<1x128xf32>
    %c0_10 = arith.constant 0 : index
    %c0_11 = arith.constant 0 : index
    %c0_12 = arith.constant 0 : index
    %284 = vector.load %arg2[%c0_10, %c0_11, %c0_12] : memref<1x1x128xf32, #tpu.memory_space<vmem>>, vector<1x1x128xf32>
    %285 = vector.shape_cast %284 : vector<1x1x128xf32> to vector<1x128xf32>
    %286 = vector.shape_cast %283 : vector<1x128xf32> to vector<1x1x128xf32>
    tpu.vector_store %arg2[%c0_10, %c0_11, %c0_12], %286 {strides = array<i32>} : memref<1x1x128xf32, #tpu.memory_space<vmem>>, vector<1x1x128xf32>,
    return
  }
  func.func @transform_0(%arg0: i32) -> (i32, i32, i32) {
    %c0_i32 = arith.constant 0 : i32
    %c0_i32_0 = arith.constant 0 : i32
    %c0_i32_1 = arith.constant 0 : i32
    return %c0_i32, %c0_i32_0, %arg0 : i32, i32, i32
  }
  func.func @transform_1(%arg0: i32) -> (i32, i32, i32) {
    %c0_i32 = arith.constant 0 : i32
    %c0_i32_0 = arith.constant 0 : i32
    %c0_i32_1 = arith.constant 0 : i32
    return %arg0, %c0_i32, %c0_i32_0 : i32, i32, i32
  }
}

</mosaic_0001>

<bundles_post_ra>
// kernel: tpu_custom_call.1
= control target key start
LH: loop header
LB: loop body
LE: loop exit
PB: predicated region body
PF: predicated region fallthrough
CT: control target
= control target key end

     0   :  { %6 = vsyncpa [#allocation3], 0  ;;  %s1370_s0 = inlined_call_operand.hbm [shape: f32[3,12,128], index: 0, kind: input, shape index: {}]   ;;  %s1371_s1 = inlined_call_operand.hbm [shape: f32[1,1,128], index: 1, kind: output, shape index: {}]  }
   0x1   :  { %7 = vsyncpa [#allocation4], 0  ;;  %s12_s8 = sshll.u32 %s1370_s0, 4  ;;  %s887_s9 = smov [#allocation2]   ;;  %s13_s8 = int_to_ptr.hbm [resolvable:$true] %s12_s8 }
   0x2   :  { %s14_s10 = sshll.u32 %s887_s9, 4  ;;  %s888_s11 = smov 128   ;;  %s15_s10 = int_to_ptr.vmem [resolvable:$true] %s14_s10 }
   0x3   :  { %s889_s12 = smov 8  }
   0x4   :  { %20 = dma.hbm_to_vmem [thread:$0]  %s13_s8, 768, %s15_s10, [#allocation3], %s888_s11, %s888_s11, %s889_s12  }
   0x5   :  { %883 = dma.done.wait [#allocation3], 768  }
   0x6   :  { %884 = vsyncadd [#allocation3], 4294966528  ;;  %v904_v0 = vld [vmem:[#allocation2] sm:$0xff]  ;;  %v910_v4 = vld [vmem:[#allocation2 + $0x8] sm:$0xf]  ;;  %vm413_vm0 = vcmask 1041408  }
   0x7   :  { %29 = vst [vmem:[#allocation1] sm:$0xff] %v904_v0  ;;  %v66_v1 = vrot.slane %v904_v0, 1  ;;  %v67_v2 = vrot.slane %v904_v0, 2  ;;  %v68_v3 = vperm.slane %v904_v0, 0  ;;  %v924_v20 = vld [vmem:[#allocation2 + $0x10] sm:$0xff]  ;;  %v945_v38 = vld [vmem:[#allocation2 + $0x20] sm:$0xff] }
   0x8   :  { %v189_v22 = vrot.slane %v924_v20, 1  ;;  %v190_v25 = vrot.slane %v924_v20, 2  ;;  %v191_v31 = vperm.slane %v924_v20, 0  ;;  %v953_v43 = vld [vmem:[#allocation2 + $0x18] sm:$0xf]  ;;  %v312_v44 = vrot.slane %v945_v38, 1 }
   0x9   :  { %v69_v5 = vperm.slane %v66_v1, 0  ;;  %v70_v6 = vperm.slane %v67_v2, 0  ;;  %v75_v7 = vsub.f32 %v68_v3, %v910_v4  ;;  %v74_v13 = vsub.f32 %v68_v3, %v904_v0  ;;  %s890_s0 = smov [#allocation5]   ;;  %s815_s16 = sshll.u32 %s1371_s1, 4  ;;  %s816_s16 = int_to_ptr.hbm [resolvable:$true] %s815_s16 }
   0xa   :  { %v192_v35 = vperm.slane %v189_v22, 0  ;;  %v193_v37 = vperm.slane %v190_v25, 0  ;;  %v313_v45 = vrot.slane %v945_v38, 2  ;;  %v197_v49 = vsub.f32 %v191_v31, %v924_v20  ;;  %s813_s13 = sshll.u32 %s890_s0, 4  ;;  %s814_s13 = int_to_ptr.vmem [resolvable:$true] %s813_s13 }
   0xb   :  { %v77_v8 = vsub.f32 %v69_v5, %v910_v4  ;;  %v79_v9 = vsub.f32 %v70_v6, %v910_v4  ;;  %v76_v18 = vsub.f32 %v69_v5, %v904_v0  ;;  %v78_v21 = vsub.f32 %v70_v6, %v904_v0 }
   0xc   :  { %v932_v26 = vmul.f32 %v74_v13, %v74_v13  ;;  %v934_v27 = vmul.f32 %v75_v7, %v75_v7  ;;  %v198_v50 = vsub.f32 %v191_v31, %v953_v43  ;;  %v199_v56 = vsub.f32 %v192_v35, %v924_v20 }
   0xd   :  { %v938_v30 = vmul.f32 %v76_v18, %v76_v18  ;;  %v941_v32 = vmul.f32 %v77_v8, %v77_v8  ;;  %v127_v33 = vmul.f32 %v78_v21, %v78_v21  ;;  %v943_v34 = vmul.f32 %v79_v9, %v79_v9 }
   0xe   :  { %v31_v10 = vld [vmem:[#allocation1 + $0x6] ss:$9 sm:$0xff]  ;;  %v201_v57 = vsub.f32 %v193_v37, %v924_v20  ;;  %v314_v58 = vperm.slane %v945_v38, 0  ;;  %v315_v59 = vperm.slane %v312_v44, 0  ;;  %v316_v60 = vperm.slane %v313_v45, 0 }
   0xf   :  { %v33_v11 = vld [vmem:[#allocation1 + $0x7] ss:$9 sm:$0xff]  ;;  %v42_v12 = vperm.slane %v31_v10, 0  ;;  %v200_v5 = vsub.f32 %v192_v35, %v953_v43  ;;  %v202_v6 = vsub.f32 %v193_v37, %v953_v43  ;;  %v247_v31 = vmul.f32 %v198_v50, %v198_v50 }
  0x10   :  { %34 = vst [vmem:[#allocation1] sm:$0xff] %v910_v4  ;;  %v43_v17 = vperm.slane %v33_v11, 0  ;;  %v246_v11 = vmul.f32 %v197_v49, %v197_v49  ;;  %v250_v13 = vmul.f32 %v201_v57, %v201_v57  ;;  %v324_v18 = vsub.f32 %v316_v60, %v945_v38 }
  0x11   :  { %v54_v23 = vsub.f32 %v42_v12, %v904_v0  ;;  %v55_v24 = vsub.f32 %v42_v12, %v910_v4  ;;  %v248_v12 = vmul.f32 %v199_v56, %v199_v56  ;;  %v249_v35 = vmul.f32 %v200_v5, %v200_v5 }
  0x12   :  { %v56_v28 = vsub.f32 %v43_v17, %v904_v0  ;;  %v57_v29 = vsub.f32 %v43_v17, %v910_v4  ;;  %v322_v17 = vsub.f32 %v315_v59, %v945_v38  ;;  %v373_v45 = vmul.f32 %v324_v18, %v324_v18 }
  0x13   :  { %v947_v39 = vmul.f32 %v54_v23, %v54_v23  ;;  %v949_v40 = vmul.f32 %v55_v24, %v55_v24  ;;  %v254_v37 = vadd.f32 %v248_v12, %v938_v30 }
  0x14   :  { %v959_v51 = vmul.f32 %v56_v28, %v56_v28  ;;  %v961_v52 = vmul.f32 %v57_v29, %v57_v29  ;;  %v371_v44 = vmul.f32 %v322_v17, %v322_v17 }
  0x17   :  { %v35_v14 = vld [vmem:[#allocation1] ss:$9 sm:$0xff]  ;;  %v919_v16 = vld [vmem:[#allocation1 + $0x2] ss:$9 sm:$0xff] }
  0x18   :  { %v917_v15 = vld [vmem:[#allocation1 + $0x1] ss:$9 sm:$0xff]  ;;  %v922_v19 = vld [vmem:[#allocation1 + $0x3] ss:$9 sm:$0xff]  ;;  %v44_v36 = vperm.slane %v35_v14, 0  ;;  %v46_v42 = vperm.slane %v919_v16, 0  ;;  %v320_v14 = vsub.f32 %v314_v58, %v945_v38 }
  0x19   :  { %80 = vst [vmem:[#allocation1] sm:$0xff] %v904_v0  ;;  %v45_v41 = vperm.slane %v917_v15, 0  ;;  %v47_v2 = vperm.slane %v922_v19, 0 }
  0x1a   :  { %v58_v3 = vsub.f32 %v44_v36, %v904_v0  ;;  %v59_v7 = vsub.f32 %v44_v36, %v910_v4  ;;  %v62_v16 = vsub.f32 %v46_v42, %v904_v0  ;;  %v63_v19 = vsub.f32 %v46_v42, %v910_v4 }
  0x1b   :  { %v60_v8 = vsub.f32 %v45_v41, %v904_v0  ;;  %v61_v15 = vsub.f32 %v45_v41, %v910_v4  ;;  %v64_v21 = vsub.f32 %v47_v2, %v904_v0  ;;  %v65_v22 = vsub.f32 %v47_v2, %v910_v4 }
  0x1c   :  { %v997_v23 = vmul.f32 %v58_v3, %v58_v3  ;;  %v999_v28 = vmul.f32 %v59_v7, %v59_v7  ;;  %v252_v36 = vadd.f32 %v246_v11, %v932_v26  ;;  %v256_v41 = vadd.f32 %v250_v13, %v127_v33 }
  0x1d   :  { %v1001_v29 = vmul.f32 %v60_v8, %v60_v8  ;;  %v1014_v26 = vmul.f32 %v63_v19, %v63_v19  ;;  %v1016_v30 = vmul.f32 %v64_v21, %v64_v21  ;;  %v1018_v33 = vmul.f32 %v65_v22, %v65_v22 }
  0x1e   :  { %v1027_v2 = vadd.f32 %v371_v44, %v254_v37  ;;  %v1029_v3 = vadd.f32 %v373_v45, %v256_v41 }
  0x20   :  { %v82_v46 = vld [vmem:[#allocation1 + $0x3] ss:$9 sm:$0xff]  ;;  %v86_v48 = vld [vmem:[#allocation1 + $0x5] ss:$9 sm:$0xff]  ;;  %v452_v37 = vperm.slane %v1029_v3, 7 }
  0x21   :  { %v84_v47 = vld [vmem:[#allocation1 + $0x4] ss:$9 sm:$0xff]  ;;  %v87_v53 = vperm.slane %v82_v46, 0  ;;  %v89_v55 = vperm.slane %v86_v48, 0  ;;  %v251_v48 = vmul.f32 %v202_v6, %v202_v6 }
  0x22   :  { %v88_v54 = vperm.slane %v84_v47, 0  ;;  %152 = vst [vmem:[#allocation1] sm:$0xff] %v924_v20  ;;  %v1006_v46 = vld [vmem:[#allocation2 + $0x28] sm:$0xf]  ;;  %v1008_v47 = vmul.f32 %v61_v15, %v61_v15 }
  0x23   :  { %v968_v61 = vsub.f32 %v87_v53, %v904_v0  ;;  %v971_v62 = vsub.f32 %v87_v53, %v910_v4  ;;  %v97_v9 = vsub.f32 %v89_v55, %v904_v0  ;;  %v987_v10 = vsub.f32 %v89_v55, %v910_v4 }
  0x24   :  { %v974_v63 = vsub.f32 %v88_v54, %v904_v0  ;;  %v977_v1 = vsub.f32 %v88_v54, %v910_v4  ;;  %v369_v0 = vmul.f32 %v320_v14, %v320_v14  ;;  %v321_v49 = vsub.f32 %v314_v58, %v1006_v46 }
  0x25   :  { %v323_v50 = vsub.f32 %v315_v59, %v1006_v46  ;;  %v1012_v53 = vmul.f32 %v62_v16, %v62_v16  ;;  %v253_v54 = vadd.f32 %v247_v31, %v934_v27  ;;  %v255_v55 = vadd.f32 %v249_v35, %v941_v32 }
  0x26   :  { %v1022_v56 = vadd.f32 %v369_v0, %v252_v36  ;;  %v325_v57 = vsub.f32 %v316_v60, %v1006_v46  ;;  %v257_v8 = vadd.f32 %v251_v48, %v943_v34  ;;  %v370_v32 = vmul.f32 %v321_v49, %v321_v49 }
  0x27   :  { %v372_v11 = vmul.f32 %v323_v50, %v323_v50  ;;  %v1036_v13 = vmul.f32 %v968_v61, %v968_v61  ;;  %v1040_v14 = vmul.f32 %v971_v62, %v971_v62  ;;  %v1044_v15 = vmul.f32 %v974_v63, %v974_v63 }
  0x28   :  { %v444_v34 = vperm.slane %v1022_v56, 6  ;;  %v374_v16 = vmul.f32 %v325_v57, %v325_v57  ;;  %v1050_v17 = vmul.f32 %v977_v1, %v977_v1  ;;  %v1052_v18 = vmul.f32 %v97_v9, %v97_v9 }
  0x29   :  { %v154_v24 = vld [vmem:[#allocation1 + $0x6] ss:$9 sm:$0xff]  ;;  %v445_v61 = vperm.slane %v1027_v2, 6  ;;  %v446_v62 = vperm.slane %v1029_v3, 6  ;;  %v1056_v63 = vadd.f32 %v370_v32, %v253_v54  ;;  %v450_v36 = vperm.slane %v1022_v56, 7 }
  0x2a   :  { %v156_v25 = vld [vmem:[#allocation1 + $0x7] ss:$9 sm:$0xff]  ;;  %v165_v42 = vperm.slane %v154_v24, 0  ;;  %v1058_v24 = vadd.f32 %v372_v11, %v255_v55  ;;  %v451_v9 = vperm.slane %v1027_v2, 7  ;;  %v1063_v41 = vadd.f32 %v374_v16, %v257_v8 }
  0x2b   :  { %157 = vst [vmem:[#allocation1] sm:$0xff] %v953_v43  ;;  %v166_v4 = vperm.slane %v156_v25, 0  ;;  %v393_v25 = vlaneseq  ;;  %v140_v0 = vmul.f32 %v987_v10, %v987_v10  ;;  %v459_v50 = vperm.slane %v1056_v63, 0 }
  0x2c   :  { %v177_v58 = vsub.f32 %v165_v42, %v924_v20  ;;  %v178_v27 = vsub.f32 %v165_v42, %v953_v43 }
  0x2d   :  { %v179_v59 = vsub.f32 %v166_v4, %v924_v20  ;;  %v180_v60 = vsub.f32 %v166_v4, %v953_v43  ;;  %v1076_v49 = vshrl.u32 %v393_v25, 7 }
  0x2e   :  { %v222_v19 = vmul.f32 %v177_v58, %v177_v58  ;;  %v223_v22 = vmul.f32 %v178_v27, %v178_v27 }
  0x2f   :  { %v224_v21 = vmul.f32 %v179_v59, %v179_v59  ;;  %v225_v1 = vmul.f32 %v180_v60, %v180_v60  ;;  %vm395_vm1 = vcmp.eq.s32.totalorder %v1076_v49, 0  ;;  %vm396_vm2 = vcmp.eq.s32.totalorder %v1076_v49, 1 }
  0x30   :  { %v1068_v44 = vadd.f32 %v222_v19, %v947_v39  ;;  %v1074_v48 = vadd.f32 %v223_v22, %v949_v40  ;;  %vm397_vm3 = vcmp.eq.s32.totalorder %v1076_v49, 2  ;;  %vm398_vm4 = vcmp.eq.s32.totalorder %v1076_v49, 3 }
  0x31   :  { %v1071_v45 = vadd.f32 %v224_v21, %v959_v51  ;;  %v1084_v51 = vadd.f32 %v225_v1, %v961_v52  ;;  %vm399_vm5 = vcmp.eq.s32.totalorder %v1076_v49, 4  ;;  %vm400_vm6 = vcmp.eq.s32.totalorder %v1076_v49, 5 }
  0x32   :  { %v158_v5 = vld [vmem:[#allocation1] ss:$9 sm:$0xff]  ;;  %v162_v7 = vld [vmem:[#allocation1 + $0x2] ss:$9 sm:$0xff] }
  0x33   :  { %v160_v6 = vld [vmem:[#allocation1 + $0x1] ss:$9 sm:$0xff]  ;;  %v164_v12 = vld [vmem:[#allocation1 + $0x3] ss:$9 sm:$0xff]  ;;  %v167_v31 = vperm.slane %v158_v5, 0  ;;  %v169_v42 = vperm.slane %v162_v7, 0 }
  0x34   :  { %203 = vst [vmem:[#allocation1] sm:$0xff] %v924_v20  ;;  %v168_v35 = vperm.slane %v160_v6, 0  ;;  %v170_v4 = vperm.slane %v164_v12, 0 }
  0x35   :  { %v181_v55 = vsub.f32 %v167_v31, %v924_v20  ;;  %v182_v10 = vsub.f32 %v167_v31, %v953_v43  ;;  %v185_v8 = vsub.f32 %v169_v42, %v924_v20  ;;  %v186_v27 = vsub.f32 %v169_v42, %v953_v43 }
  0x36   :  { %v183_v57 = vsub.f32 %v168_v35, %v924_v20  ;;  %v184_v40 = vsub.f32 %v168_v35, %v953_v43  ;;  %v187_v32 = vsub.f32 %v170_v4, %v924_v20  ;;  %v188_v11 = vsub.f32 %v170_v4, %v953_v43 }
  0x37   :  { %v226_v19 = vmul.f32 %v181_v55, %v181_v55  ;;  %v227_v21 = vmul.f32 %v182_v10, %v182_v10  ;;  %v230_v54 = vmul.f32 %v185_v8, %v185_v8 }
  0x38   :  { %v229_v4 = vmul.f32 %v184_v40, %v184_v40  ;;  %v233_v8 = vmul.f32 %v188_v11, %v188_v11 }
  0x3b   :  { %v205_v39 = vld [vmem:[#allocation1 + $0x3] ss:$9 sm:$0xff]  ;;  %v209_v59 = vld [vmem:[#allocation1 + $0x5] ss:$9 sm:$0xff] }
  0x3c   :  { %v207_v58 = vld [vmem:[#allocation1 + $0x4] ss:$9 sm:$0xff]  ;;  %v210_v5 = vperm.slane %v205_v39, 0  ;;  %v212_v7 = vperm.slane %v209_v59, 0  ;;  %v228_v39 = vmul.f32 %v183_v57, %v183_v57 }
  0x3d   :  { %v211_v6 = vperm.slane %v207_v58, 0  ;;  %275 = vst [vmem:[#allocation1] sm:$0xff] %v945_v38 }
  0x3e   :  { %v216_v12 = vsub.f32 %v210_v5, %v924_v20  ;;  %v217_v52 = vsub.f32 %v210_v5, %v953_v43  ;;  %v220_v22 = vsub.f32 %v212_v7, %v924_v20  ;;  %v221_v25 = vsub.f32 %v212_v7, %v953_v43 }
  0x3f   :  { %v218_v60 = vsub.f32 %v211_v6, %v924_v20  ;;  %v219_v16 = vsub.f32 %v211_v6, %v953_v43  ;;  %v231_v20 = vmul.f32 %v186_v27, %v186_v27 }
  0x40   :  { %v258_v31 = vmul.f32 %v216_v12, %v216_v12  ;;  %v259_v35 = vmul.f32 %v217_v52, %v217_v52  ;;  %v262_v58 = vmul.f32 %v220_v22, %v220_v22  ;;  %v263_v59 = vmul.f32 %v221_v25, %v221_v25 }
  0x41   :  { %v260_v1 = vmul.f32 %v218_v60, %v218_v60  ;;  %v261_v42 = vmul.f32 %v219_v16, %v219_v16  ;;  %v469_v60 = vperm.slane %v1058_v24, 1  ;;  %v477_v16 = vperm.slane %v1056_v63, 2 }
  0x42   :  { %v1099_v5 = vadd.f32 %v258_v31, %v1036_v13  ;;  %v1102_v6 = vadd.f32 %v259_v35, %v1040_v14  ;;  %v1111_v57 = vadd.f32 %v262_v58, %v1052_v18  ;;  %v1113_v40 = vadd.f32 %v263_v59, %v140_v0 }
  0x43   :  { %v1105_v55 = vadd.f32 %v260_v1, %v1044_v15  ;;  %v1108_v7 = vadd.f32 %v261_v42, %v1050_v17  ;;  %v232_v13 = vmul.f32 %v187_v32, %v187_v32  ;;  %v1119_v15 = vadd.f32 %v226_v19, %v997_v23 }
  0x44   :  { %v277_v43 = vld [vmem:[#allocation1 + $0x6] ss:$9 sm:$0xff]  ;;  %v1122_v17 = vadd.f32 %v227_v21, %v999_v28  ;;  %v461_v18 = vperm.slane %v1063_v41, 0  ;;  %v468_v0 = vperm.slane %v1056_v63, 1  ;;  %v470_v23 = vperm.slane %v1063_v41, 1 }
  0x45   :  { %v279_v10 = vld [vmem:[#allocation1 + $0x7] ss:$9 sm:$0xff]  ;;  %v288_v12 = vperm.slane %v277_v43, 0  ;;  %v478_v28 = vperm.slane %v1058_v24, 2  ;;  %v479_v31 = vperm.slane %v1063_v41, 2 }
  0x46   :  { %v289_v14 = vperm.slane %v279_v10, 0  ;;  %280 = vst [vmem:[#allocation1] sm:$0xff] %v1006_v46 }
  0x47   :  { %v300_v27 = vsub.f32 %v288_v12, %v945_v38  ;;  %v301_v32 = vsub.f32 %v288_v12, %v1006_v46  ;;  %v240_v12 = vadd.f32 %v228_v39, %v1001_v29 }
  0x48   :  { %v302_v11 = vsub.f32 %v289_v14, %v945_v38  ;;  %v303_v52 = vsub.f32 %v289_v14, %v1006_v46  ;;  %v241_v14 = vadd.f32 %v229_v4, %v1008_v47 }
  0x49   :  { %v345_v19 = vmul.f32 %v300_v27, %v300_v27  ;;  %v346_v21 = vmul.f32 %v301_v32, %v301_v32  ;;  %v242_v27 = vadd.f32 %v230_v54, %v1012_v53  ;;  %v243_v32 = vadd.f32 %v231_v20, %v1014_v26 }
  0x4a   :  { %v347_v22 = vmul.f32 %v302_v11, %v302_v11  ;;  %v348_v25 = vmul.f32 %v303_v52, %v303_v52 }
  0x4b   :  { %v357_v58 = vadd.f32 %v345_v19, %v1068_v44  ;;  %v358_v59 = vadd.f32 %v346_v21, %v1074_v48 }
  0x4c   :  { %v359_v43 = vadd.f32 %v347_v22, %v1071_v45  ;;  %v360_v10 = vadd.f32 %v348_v25, %v1084_v51  ;;  %v244_v45 = vadd.f32 %v232_v13, %v1016_v30  ;;  %v245_v51 = vadd.f32 %v233_v8, %v1018_v33 }
  0x4d   :  { %v281_v11 = vld [vmem:[#allocation1] ss:$9 sm:$0xff]  ;;  %v285_v1 = vld [vmem:[#allocation1 + $0x2] ss:$9 sm:$0xff]  ;;  %v414_v42 = vrot.slane %v357_v58, 6  ;;  %v415_v35 = vrot.slane %v358_v59, 6 }
  0x4e   :  { %v283_v52 = vld [vmem:[#allocation1 + $0x1] ss:$9 sm:$0xff]  ;;  %v417_v44 = vrot.slane %v359_v43, 6  ;;  %v418_v19 = vrot.slane %v360_v10, 6  ;;  %v287_v48 = vld [vmem:[#allocation1 + $0x3] ss:$9 sm:$0xff] }
  0x4f   :  { %v290_v21 = vperm.slane %v281_v11, 0  ;;  %v291_v29 = vperm.slane %v283_v52, 0  ;;  %326 = vst [vmem:[#allocation1] sm:$0xff] %v945_v38  ;;  %v416_v47 = vsel %vm413_vm0, %v414_v42, %v415_v35  ;;  %v292_v26 = vperm.slane %v285_v1, 0 }
  0x50   :  { %v419_v53 = vsel %vm413_vm0, %v417_v44, %v418_v19  ;;  %v293_v54 = vperm.slane %v287_v48, 0  ;;  %v1153_v39 = vsel %vm395_vm1, 0.0, %v416_v47 }
  0x51   :  { %v1157_v4 = vsel %vm396_vm2, 0.0, %v419_v53  ;;  %v304_v30 = vsub.f32 %v290_v21, %v945_v38  ;;  %v305_v33 = vsub.f32 %v290_v21, %v1006_v46  ;;  %v1164_v20 = vmax.f32 %v444_v34, %v1153_v39 }
  0x52   :  { %v1169_v13 = vmax.f32 %v445_v61, %v1153_v39  ;;  %v1174_v8 = vmax.f32 %v446_v62, %v1153_v39  ;;  %v453_v22 = vmax.f32 %v450_v36, %v1157_v4  ;;  %v454_v34 = vmax.f32 %v451_v9, %v1157_v4 }
  0x53   :  { %v455_v61 = vmax.f32 %v452_v37, %v1157_v4  ;;  %v306_v25 = vsub.f32 %v291_v29, %v945_v38  ;;  %v307_v62 = vsub.f32 %v291_v29, %v1006_v46  ;;  %v308_v36 = vsub.f32 %v292_v26, %v945_v38 }
  0x54   :  { %v456_v56 = vmin.f32 %v1164_v20, %v453_v22  ;;  %v309_v35 = vsub.f32 %v292_v26, %v1006_v46  ;;  %v310_v2 = vsub.f32 %v293_v54, %v945_v38  ;;  %v457_v9 = vmin.f32 %v1169_v13, %v454_v34 }
  0x55   :  { %v458_v3 = vmin.f32 %v1174_v8, %v455_v61  ;;  %v311_v37 = vsub.f32 %v293_v54, %v1006_v46  ;;  %v349_v1 = vmul.f32 %v304_v30, %v304_v30  ;;  %v350_v42 = vmul.f32 %v305_v33, %v305_v33 }
  0x56   :  { %v351_v58 = vmul.f32 %v306_v25, %v306_v25  ;;  %v352_v59 = vmul.f32 %v307_v62, %v307_v62  ;;  %v353_v43 = vmul.f32 %v308_v36, %v308_v36  ;;  %v354_v10 = vmul.f32 %v309_v35, %v309_v35  ;;  %v328_v47 = vld [vmem:[#allocation1 + $0x3] ss:$9 sm:$0xff]  ;;  %v332_v33 = vld [vmem:[#allocation1 + $0x5] ss:$9 sm:$0xff] }
  0x57   :  { %v355_v11 = vmul.f32 %v310_v2, %v310_v2  ;;  %v356_v52 = vmul.f32 %v311_v37, %v311_v37  ;;  %v361_v44 = vadd.f32 %v349_v1, %v1119_v15  ;;  %v362_v19 = vadd.f32 %v350_v42, %v1122_v17  ;;  %v330_v30 = vld [vmem:[#allocation1 + $0x4] ss:$9 sm:$0xff] }
  0x58   :  { %v363_v48 = vadd.f32 %v351_v58, %v240_v12  ;;  %v364_v21 = vadd.f32 %v352_v59, %v241_v14  ;;  %v365_v29 = vadd.f32 %v353_v43, %v242_v27  ;;  %v366_v53 = vadd.f32 %v354_v10, %v243_v32 }
  0x59   :  { %v367_v26 = vadd.f32 %v355_v11, %v244_v45  ;;  %v368_v20 = vadd.f32 %v356_v52, %v245_v51  ;;  %v420_v54 = vrot.slane %v361_v44, 6  ;;  %v421_v13 = vrot.slane %v362_v19, 6 }
  0x5a   :  { %v423_v8 = vrot.slane %v363_v48, 6  ;;  %v424_v22 = vrot.slane %v364_v21, 6  ;;  %v426_v34 = vrot.slane %v365_v29, 6  ;;  %v427_v61 = vrot.slane %v366_v53, 6 }
  0x5b   :  { %v429_v25 = vrot.slane %v367_v26, 6  ;;  %v430_v62 = vrot.slane %v368_v20, 6  ;;  %v333_v15 = vperm.slane %v328_v47, 0  ;;  %v422_v17 = vsel %vm413_vm0, %v420_v54, %v421_v13 }
  0x5c   :  { %v425_v12 = vsel %vm413_vm0, %v423_v8, %v424_v22  ;;  %v334_v14 = vperm.slane %v330_v30, 0  ;;  %v335_v27 = vperm.slane %v332_v33, 0  ;;  %v428_v32 = vsel %vm413_vm0, %v426_v34, %v427_v61 }
  0x5d   :  { %v431_v45 = vsel %vm413_vm0, %v429_v25, %v430_v62  ;;  %v1206_v51 = vsel %vm397_vm3, 0.0, %v422_v17  ;;  %v1210_v36 = vsel %vm398_vm4, 0.0, %v425_v12  ;;  %v1214_v35 = vsel %vm399_vm5, 0.0, %v428_v32 }
  0x5e   :  { %v1218_v2 = vsel %vm400_vm6, 0.0, %v431_v45  ;;  %v462_v37 = vmax.f32 %v459_v50, %v1206_v51  ;;  %v1372_v1 = vperm.slane %v1058_v24, 0  ;;  %v464_v58 = vmax.f32 %v461_v18, %v1206_v51 }
  0x5f   :  { %v471_v59 = vmax.f32 %v468_v0, %v1210_v36  ;;  %v472_v49 = vmax.f32 %v469_v60, %v1210_v36  ;;  %v473_v50 = vmax.f32 %v470_v23, %v1210_v36  ;;  %v480_v11 = vmax.f32 %v477_v16, %v1214_v35 }
  0x60   :  { %v463_v42 = vmax.f32 %v1372_v1, %v1206_v51  ;;  %v465_v43 = vmin.f32 %v456_v56, %v462_v37  ;;  %v481_v18 = vmax.f32 %v478_v28, %v1214_v35  ;;  %v467_v52 = vmin.f32 %v458_v3, %v464_v58 }
  0x61   :  { %v482_v0 = vmax.f32 %v479_v31, %v1214_v35  ;;  %v1373_v60 = vperm.slane %v1056_v63, 3  ;;  %v1374_v23 = vperm.slane %v1058_v24, 3  ;;  %v1375_v16 = vperm.slane %v1063_v41, 3 }
  0x62   :  { %v466_v10 = vmin.f32 %v457_v9, %v463_v42  ;;  %v474_v9 = vmin.f32 %v465_v43, %v471_v59  ;;  %v339_v28 = vsub.f32 %v333_v15, %v945_v38  ;;  %v476_v3 = vmin.f32 %v467_v52, %v473_v50 }
  0x63   :  { %v489_v44 = vmax.f32 %v1373_v60, %v1218_v2  ;;  %v490_v56 = vmax.f32 %v1374_v23, %v1218_v2  ;;  %v491_v48 = vmax.f32 %v1375_v16, %v1218_v2  ;;  %v340_v21 = vsub.f32 %v333_v15, %v1006_v46 }
  0x64   :  { %v475_v19 = vmin.f32 %v466_v10, %v472_v49  ;;  %v341_v31 = vsub.f32 %v334_v14, %v945_v38  ;;  %v342_v63 = vsub.f32 %v334_v14, %v1006_v46  ;;  %v483_v29 = vmin.f32 %v474_v9, %v480_v11 }
  0x65   :  { %v343_v24 = vsub.f32 %v335_v27, %v945_v38  ;;  %v344_v53 = vsub.f32 %v335_v27, %v1006_v46  ;;  %v485_v26 = vmin.f32 %v476_v3, %v482_v0  ;;  %v381_v20 = vmul.f32 %v339_v28, %v339_v28 }
  0x66   :  { %v484_v47 = vmin.f32 %v475_v19, %v481_v18  ;;  %v382_v54 = vmul.f32 %v340_v21, %v340_v21  ;;  %v383_v41 = vmul.f32 %v341_v31, %v341_v31  ;;  %v492_v30 = vmin.f32 %v483_v29, %v489_v44 }
  0x67   :  { %v384_v13 = vmul.f32 %v342_v63, %v342_v63  ;;  %v385_v8 = vmul.f32 %v343_v24, %v343_v24  ;;  %v494_v22 = vmin.f32 %v485_v26, %v491_v48  ;;  %v386_v34 = vmul.f32 %v344_v53, %v344_v53 }
  0x68   :  { %v493_v33 = vmin.f32 %v484_v47, %v490_v56  ;;  %v1263_v61 = vadd.f32 %v381_v20, %v1099_v5  ;;  %v1266_v25 = vadd.f32 %v382_v54, %v1102_v6  ;;  %v495_v62 = vperm.slane %v492_v30, 0 }
  0x69   :  { %v501_v15 = vperm.slane %v492_v30, 1  ;;  %v497_v17 = vperm.slane %v494_v22, 0  ;;  %v503_v12 = vperm.slane %v494_v22, 1  ;;  %v510_v14 = vperm.slane %v492_v30, 2 }
  0x6a   :  { %v496_v38 = vperm.slane %v493_v33, 0  ;;  %v502_v46 = vperm.slane %v493_v33, 1  ;;  %v511_v27 = vperm.slane %v493_v33, 2  ;;  %v498_v32 = vmax.f32 %v495_v62, %v1153_v39 }
  0x6b   :  { %v504_v37 = vmax.f32 %v501_v15, %v1157_v4  ;;  %v500_v1 = vmax.f32 %v497_v17, %v1153_v39  ;;  %v506_v6 = vmax.f32 %v503_v12, %v1157_v4  ;;  %v512_v42 = vperm.slane %v494_v22, 2 }
  0x6c   :  { %v499_v45 = vmax.f32 %v496_v38, %v1153_v39  ;;  %v505_v5 = vmax.f32 %v502_v46, %v1157_v4  ;;  %v513_v58 = vmax.f32 %v510_v14, %v1206_v51  ;;  %v514_v50 = vmax.f32 %v511_v27, %v1206_v51 }
  0x6d   :  { %v507_v59 = vmin.f32 %v498_v32, %v504_v37  ;;  %v519_v43 = vperm.slane %v492_v30, 3  ;;  %v509_v10 = vmin.f32 %v500_v1, %v506_v6  ;;  %v515_v11 = vmax.f32 %v512_v42, %v1206_v51 }
  0x6e   :  { %v508_v49 = vmin.f32 %v499_v45, %v505_v5  ;;  %v520_v18 = vperm.slane %v493_v33, 3  ;;  %v521_v52 = vperm.slane %v494_v22, 3  ;;  %v528_v23 = vperm.slane %v492_v30, 4 }
  0x6f   :  { %v516_v0 = vmin.f32 %v507_v59, %v513_v58  ;;  %v522_v44 = vmax.f32 %v519_v43, %v1210_v36  ;;  %v518_v56 = vmin.f32 %v509_v10, %v515_v11  ;;  %v529_v16 = vperm.slane %v493_v33, 4 }
  0x70   :  { %v517_v60 = vmin.f32 %v508_v49, %v514_v50  ;;  %v523_v9 = vmax.f32 %v520_v18, %v1210_v36  ;;  %v524_v19 = vmax.f32 %v521_v52, %v1210_v36  ;;  %v530_v28 = vperm.slane %v494_v22, 4 }
  0x71   :  { %v525_v48 = vmin.f32 %v516_v0, %v522_v44  ;;  %v531_v3 = vmax.f32 %v528_v23, %v1214_v35  ;;  %v537_v21 = vperm.slane %v492_v30, 5  ;;  %v532_v29 = vmax.f32 %v529_v16, %v1214_v35 }
  0x72   :  { %v526_v31 = vmin.f32 %v517_v60, %v523_v9  ;;  %v527_v63 = vmin.f32 %v518_v56, %v524_v19  ;;  %v538_v47 = vperm.slane %v493_v33, 5  ;;  %v533_v24 = vmax.f32 %v530_v28, %v1214_v35 }
  0x73   :  { %v534_v53 = vmin.f32 %v525_v48, %v531_v3  ;;  %v539_v26 = vperm.slane %v494_v22, 5  ;;  %v540_v20 = vmax.f32 %v537_v21, %v1218_v2  ;;  %v1286_v38 = vadd.f32 %v383_v41, %v1105_v55 }
  0x74   :  { %v535_v54 = vmin.f32 %v526_v31, %v532_v29  ;;  %v541_v62 = vmax.f32 %v538_v47, %v1218_v2  ;;  %v1289_v15 = vadd.f32 %v384_v13, %v1108_v7  ;;  %v536_v30 = vmin.f32 %v527_v63, %v533_v24 }
  0x75   :  { %v542_v46 = vmax.f32 %v539_v26, %v1218_v2  ;;  %v543_v17 = vmin.f32 %v534_v53, %v540_v20  ;;  %v1293_v33 = vadd.f32 %v385_v8, %v1111_v57  ;;  %v1296_v22 = vadd.f32 %v386_v34, %v1113_v40 }
  0x76   :  { %v544_v12 = vmin.f32 %v535_v54, %v541_v62  ;;  %v705_v14 = vrot.slane %v1263_v61, 6  ;;  %v706_v27 = vrot.slane %v1266_v25, 6 }
  0x77   :  { %v545_v55 = vmin.f32 %v536_v30, %v542_v46  ;;  %v546_v41 = vperm.slane %v543_v17, 0  ;;  %v552_v32 = vperm.slane %v543_v17, 1  ;;  %v561_v7 = vperm.slane %v543_v17, 2 }
  0x78   :  { %v547_v13 = vperm.slane %v544_v12, 0  ;;  %v553_v45 = vperm.slane %v544_v12, 1  ;;  %v562_v37 = vperm.slane %v544_v12, 2  ;;  %v570_v5 = vperm.slane %v543_v17, 3 }
  0x79   :  { %v548_v1 = vperm.slane %v545_v55, 0  ;;  %v549_v57 = vmax.f32 %v546_v41, %v1153_v39  ;;  %v554_v8 = vperm.slane %v545_v55, 1  ;;  %v555_v6 = vmax.f32 %v552_v32, %v1157_v4 }
  0x7a   :  { %v550_v40 = vmax.f32 %v547_v13, %v1153_v39  ;;  %v556_v34 = vmax.f32 %v553_v45, %v1157_v4  ;;  %v563_v61 = vperm.slane %v545_v55, 2  ;;  %v564_v25 = vmax.f32 %v561_v7, %v1206_v51 }
  0x7b   :  { %v551_v42 = vmax.f32 %v548_v1, %v1153_v39  ;;  %v557_v58 = vmax.f32 %v554_v8, %v1157_v4  ;;  %v558_v59 = vmin.f32 %v549_v57, %v555_v6  ;;  %v565_v49 = vmax.f32 %v562_v37, %v1206_v51 }
  0x7c   :  { %v559_v50 = vmin.f32 %v550_v40, %v556_v34  ;;  %v566_v43 = vmax.f32 %v563_v61, %v1206_v51  ;;  %v571_v10 = vperm.slane %v544_v12, 3  ;;  %v572_v11 = vperm.slane %v545_v55, 3 }
  0x7d   :  { %v560_v18 = vmin.f32 %v551_v42, %v557_v58  ;;  %v567_v52 = vmin.f32 %v558_v59, %v564_v25  ;;  %v573_v0 = vmax.f32 %v570_v5, %v1210_v36  ;;  %v579_v60 = vperm.slane %v543_v17, 4 }
  0x7e   :  { %v568_v44 = vmin.f32 %v559_v50, %v565_v49  ;;  %v574_v23 = vmax.f32 %v571_v10, %v1210_v36  ;;  %v575_v56 = vmax.f32 %v572_v11, %v1210_v36  ;;  %v580_v9 = vperm.slane %v544_v12, 4 }
  0x7f   :  { %v569_v19 = vmin.f32 %v560_v18, %v566_v43  ;;  %v576_v16 = vmin.f32 %v567_v52, %v573_v0  ;;  %v581_v48 = vperm.slane %v545_v55, 4  ;;  %v582_v28 = vmax.f32 %v579_v60, %v1214_v35 }
  0x80   :  { %v577_v3 = vmin.f32 %v568_v44, %v574_v23  ;;  %v583_v21 = vmax.f32 %v580_v9, %v1214_v35  ;;  %v588_v31 = vperm.slane %v543_v17, 5  ;;  %v589_v63 = vperm.slane %v544_v12, 5 }
  0x81   :  { %v578_v29 = vmin.f32 %v569_v19, %v575_v56  ;;  %v584_v47 = vmax.f32 %v581_v48, %v1214_v35  ;;  %v585_v24 = vmin.f32 %v576_v16, %v582_v28  ;;  %v590_v53 = vperm.slane %v545_v55, 5 }
  0x82   :  { %v586_v26 = vmin.f32 %v577_v3, %v583_v21  ;;  %v591_v20 = vmax.f32 %v588_v31, %v1218_v2  ;;  %v592_v54 = vmax.f32 %v589_v63, %v1218_v2  ;;  %v1318_v62 = vsel %vm413_vm0, %v705_v14, %v706_v27 }
  0x83   :  { %v587_v30 = vmin.f32 %v578_v29, %v584_v47  ;;  %v593_v46 = vmax.f32 %v590_v53, %v1218_v2  ;;  %v708_v41 = vrot.slane %v1286_v38, 6  ;;  %v709_v17 = vrot.slane %v1289_v15, 6 }
  0x84   :  { %v594_v12 = vmin.f32 %v585_v24, %v591_v20  ;;  %v595_v32 = vmin.f32 %v586_v26, %v592_v54  ;;  %v711_v13 = vrot.slane %v1293_v33, 6  ;;  %v712_v45 = vrot.slane %v1296_v22, 6 }
  0x85   :  { %v596_v7 = vmin.f32 %v587_v30, %v593_v46  ;;  %v1324_v55 = vsel %vm413_vm0, %v708_v41, %v709_v17 }
  0x86   :  { %v597_v37 = vperm.slane %v594_v12, 0  ;;  %v598_v14 = vperm.slane %v595_v32, 0  ;;  %v603_v27 = vperm.slane %v594_v12, 1  ;;  %v604_v5 = vperm.slane %v595_v32, 1 }
  0x87   :  { %v599_v1 = vperm.slane %v596_v7, 0  ;;  %v605_v57 = vperm.slane %v596_v7, 1  ;;  %v612_v8 = vperm.slane %v594_v12, 2  ;;  %v613_v38 = vperm.slane %v595_v32, 2 }
  0x88   :  { %v600_v15 = vmax.f32 %v597_v37, %v1153_v39  ;;  %v601_v6 = vmax.f32 %v598_v14, %v1153_v39  ;;  %v606_v40 = vmax.f32 %v603_v27, %v1157_v4  ;;  %v607_v34 = vmax.f32 %v604_v5, %v1157_v4 }
  0x89   :  { %v602_v33 = vmax.f32 %v599_v1, %v1153_v39  ;;  %v608_v22 = vmax.f32 %v605_v57, %v1157_v4  ;;  %v614_v61 = vperm.slane %v596_v7, 2  ;;  %v615_v25 = vmax.f32 %v612_v8, %v1206_v51 }
  0x8a   :  { %v609_v42 = vmin.f32 %v600_v15, %v606_v40  ;;  %v610_v58 = vmin.f32 %v601_v6, %v607_v34  ;;  %v616_v59 = vmax.f32 %v613_v38, %v1206_v51  ;;  %v621_v49 = vperm.slane %v594_v12, 3 }
  0x8b   :  { %v611_v50 = vmin.f32 %v602_v33, %v608_v22  ;;  %v617_v43 = vmax.f32 %v614_v61, %v1206_v51  ;;  %v622_v10 = vperm.slane %v595_v32, 3  ;;  %v623_v11 = vperm.slane %v596_v7, 3 }
  0x8c   :  { %v618_v18 = vmin.f32 %v609_v42, %v615_v25  ;;  %v619_v52 = vmin.f32 %v610_v58, %v616_v59  ;;  %v624_v0 = vmax.f32 %v621_v49, %v1210_v36  ;;  %v630_v60 = vperm.slane %v594_v12, 4 }
  0x8d   :  { %v620_v44 = vmin.f32 %v611_v50, %v617_v43  ;;  %v625_v23 = vmax.f32 %v622_v10, %v1210_v36  ;;  %v626_v56 = vmax.f32 %v623_v11, %v1210_v36  ;;  %v631_v9 = vperm.slane %v595_v32, 4 }
  0x8e   :  { %v627_v19 = vmin.f32 %v618_v18, %v624_v0  ;;  %v632_v16 = vperm.slane %v596_v7, 4  ;;  %v633_v48 = vmax.f32 %v630_v60, %v1214_v35  ;;  %v639_v28 = vperm.slane %v594_v12, 5 }
  0x8f   :  { %v628_v3 = vmin.f32 %v619_v52, %v625_v23  ;;  %v629_v21 = vmin.f32 %v620_v44, %v626_v56  ;;  %v634_v31 = vmax.f32 %v631_v9, %v1214_v35  ;;  %v640_v63 = vperm.slane %v595_v32, 5 }
  0x90   :  { %v635_v29 = vmax.f32 %v632_v16, %v1214_v35  ;;  %v636_v47 = vmin.f32 %v627_v19, %v633_v48  ;;  %v641_v24 = vperm.slane %v596_v7, 5  ;;  %v642_v53 = vmax.f32 %v639_v28, %v1218_v2 }
  0x91   :  { %v637_v26 = vmin.f32 %v628_v3, %v634_v31  ;;  %v643_v20 = vmax.f32 %v640_v63, %v1218_v2  ;;  %v713_v54 = vsel %vm413_vm0, %v711_v13, %v712_v45 }
  0x92   :  { %v638_v30 = vmin.f32 %v629_v21, %v635_v29  ;;  %v644_v46 = vmax.f32 %v641_v24, %v1218_v2  ;;  %v645_v41 = vmin.f32 %v636_v47, %v642_v53 }
  0x93   :  { %v646_v17 = vmin.f32 %v637_v26, %v643_v20 }
  0x94   :  { %v647_v12 = vmin.f32 %v638_v30, %v644_v46  ;;  %v648_v37 = vperm.slane %v645_v41, 0  ;;  %v654_v14 = vperm.slane %v645_v41, 1  ;;  %v663_v32 = vperm.slane %v645_v41, 2 }
  0x95   :  { %v649_v27 = vperm.slane %v646_v17, 0  ;;  %v655_v5 = vperm.slane %v646_v17, 1  ;;  %v664_v1 = vperm.slane %v646_v17, 2  ;;  %v672_v7 = vperm.slane %v645_v41, 3 }
  0x96   :  { %v650_v57 = vperm.slane %v647_v12, 0  ;;  %v651_v8 = vmax.f32 %v648_v37, %v1153_v39  ;;  %v656_v38 = vperm.slane %v647_v12, 1  ;;  %v657_v15 = vmax.f32 %v654_v14, %v1157_v4 }
  0x97   :  { %v652_v13 = vmax.f32 %v649_v27, %v1153_v39  ;;  %v658_v45 = vmax.f32 %v655_v5, %v1157_v4  ;;  %v665_v6 = vperm.slane %v647_v12, 2  ;;  %v666_v40 = vmax.f32 %v663_v32, %v1206_v51 }
  0x98   :  { %v653_v34 = vmax.f32 %v650_v57, %v1153_v39  ;;  %v659_v33 = vmax.f32 %v656_v38, %v1157_v4  ;;  %v660_v22 = vmin.f32 %v651_v8, %v657_v15  ;;  %v667_v61 = vmax.f32 %v664_v1, %v1206_v51 }
  0x99   :  { %v661_v25 = vmin.f32 %v652_v13, %v658_v45  ;;  %v668_v42 = vmax.f32 %v665_v6, %v1206_v51  ;;  %v673_v58 = vperm.slane %v646_v17, 3  ;;  %v674_v59 = vperm.slane %v647_v12, 3 }
  0x9a   :  { %v662_v49 = vmin.f32 %v653_v34, %v659_v33  ;;  %v669_v50 = vmin.f32 %v660_v22, %v666_v40  ;;  %v675_v43 = vmax.f32 %v672_v7, %v1210_v36  ;;  %v681_v10 = vperm.slane %v645_v41, 4 }
  0x9b   :  { %v670_v11 = vmin.f32 %v661_v25, %v667_v61  ;;  %v676_v18 = vmax.f32 %v673_v58, %v1210_v36  ;;  %v677_v39 = vmax.f32 %v674_v59, %v1210_v36  ;;  %v682_v52 = vperm.slane %v646_v17, 4 }
  0x9c   :  { %v671_v4 = vmin.f32 %v662_v49, %v668_v42  ;;  %v678_v0 = vmin.f32 %v669_v50, %v675_v43  ;;  %v683_v60 = vperm.slane %v647_v12, 4  ;;  %v684_v44 = vmax.f32 %v681_v10, %v1214_v35 }
  0x9d   :  { %v679_v23 = vmin.f32 %v670_v11, %v676_v18  ;;  %v685_v51 = vmax.f32 %v682_v52, %v1214_v35  ;;  %v690_v56 = vperm.slane %v645_v41, 5  ;;  %v691_v9 = vperm.slane %v646_v17, 5 }
  0x9e   :  { %v680_v19 = vmin.f32 %v671_v4, %v677_v39  ;;  %v686_v16 = vmax.f32 %v683_v60, %v1214_v35  ;;  %v687_v48 = vmin.f32 %v678_v0, %v684_v44  ;;  %v692_v28 = vperm.slane %v647_v12, 5 }
  0x9f   :  { %v688_v3 = vmin.f32 %v679_v23, %v685_v51  ;;  %v693_v21 = vmax.f32 %v690_v56, %v1218_v2  ;;  %v694_v36 = vmax.f32 %v691_v9, %v1218_v2 }
  0xa0   :  { %v689_v31 = vmin.f32 %v680_v19, %v686_v16  ;;  %v695_v63 = vmax.f32 %v692_v28, %v1218_v2 }
  0xa1   :  { %v696_v29 = vmin.f32 %v687_v48, %v693_v21  ;;  %v697_v47 = vmin.f32 %v688_v3, %v694_v36 }
  0xa2   :  { %v698_v24 = vmin.f32 %v689_v31, %v695_v63 }
  0xa3   :  { %v717_v53 = vmax.f32 %v696_v29, %v1318_v62  ;;  %v718_v26 = vmax.f32 %v697_v47, %v1324_v55 }
  0xa4   :  { %v719_v20 = vmax.f32 %v698_v24, %v713_v54 }
  0xa5   :  { %v723_v30 = vrot.slane %v717_v53, 1  ;;  %v724_v35 = vrot.slane %v718_v26, 1  ;;  %v732_v12 = vrot.slane %v717_v53, 2  ;;  %v733_v37 = vrot.slane %v718_v26, 2 }
  0xa6   :  { %v725_v46 = vrot.slane %v719_v20, 1  ;;  %v734_v32 = vrot.slane %v719_v20, 2  ;;  %v741_v2 = vrot.slane %v717_v53, 3  ;;  %v742_v1 = vrot.slane %v718_v26, 3 }
  0xa7   :  { %v729_v41 = vmin.f32 %v717_v53, %v723_v30  ;;  %v730_v17 = vmin.f32 %v718_v26, %v724_v35  ;;  %v743_v57 = vrot.slane %v719_v20, 3  ;;  %v750_v38 = vrot.slane %v717_v53, 4 }
  0xa8   :  { %v731_v14 = vmin.f32 %v719_v20, %v725_v46  ;;  %v751_v55 = vrot.slane %v718_v26, 4  ;;  %v752_v15 = vrot.slane %v719_v20, 4  ;;  %v759_v6 = vrot.slane %v717_v53, 5 }
  0xa9   :  { %v738_v27 = vmin.f32 %v729_v41, %v732_v12  ;;  %v739_v5 = vmin.f32 %v730_v17, %v733_v37  ;;  %v760_v40 = vrot.slane %v718_v26, 5  ;;  %v761_v33 = vrot.slane %v719_v20, 5 }
  0xaa   :  { %v740_v7 = vmin.f32 %v731_v14, %v734_v32 }
  0xab   :  { %v747_v8 = vmin.f32 %v738_v27, %v741_v2  ;;  %v748_v62 = vmin.f32 %v739_v5, %v742_v1 }
  0xac   :  { %v749_v54 = vmin.f32 %v740_v7, %v743_v57 }
  0xad   :  { %v756_v13 = vmin.f32 %v747_v8, %v750_v38  ;;  %v757_v45 = vmin.f32 %v748_v62, %v751_v55 }
  0xae   :  { %v758_v34 = vmin.f32 %v749_v54, %v752_v15 }
  0xaf   :  { %v765_v22 = vmin.f32 %v756_v13, %v759_v6  ;;  %v766_v61 = vmin.f32 %v757_v45, %v760_v40 }
  0xb0   :  { %v767_v25 = vmin.f32 %v758_v34, %v761_v33 }
  0xb1   :  { %829 = vrsqrt.f32 %v765_v22  ;;  %vm775_vm7 = vcmp.eq.f32.partialorder %v765_v22, inf  ;;  %vm777_vm8 = vcmp.eq.f32.partialorder %v765_v22, 0.0  ;;  %v778_v19 = vand.u32 2147483648, %v765_v22 }
  0xb2   :  { %831 = vrsqrt.f32 %v766_v61  ;;  %vm787_vm9 = vcmp.eq.f32.partialorder %v766_v61, inf  ;;  %v790_v28 = vand.u32 2147483648, %v766_v61  ;;  %vm789_vm10 = vcmp.eq.f32.partialorder %v766_v61, 0.0 }
  0xb3   :  { %833 = vrsqrt.f32 %v767_v25  ;;  %vm799_vm11 = vcmp.eq.f32.partialorder %v767_v25, inf  ;;  %v802_v29 = vand.u32 2147483648, %v767_v25  ;;  %vm801_vm12 = vcmp.eq.f32.partialorder %v767_v25, 0.0 }
  0xb7   :  { %v830_v42 = vpop.eup %829 }
  0xb8   :  { %v832_v58 = vpop.eup %831  ;;  %v769_v59 = vmul.f32 %v830_v42, %v765_v22 }
  0xb9   :  { %v834_v49 = vpop.eup %833  ;;  %v781_v50 = vmul.f32 %v832_v58, %v766_v61 }
  0xba   :  { %v770_v43 = vmul.f32 %v830_v42, %v769_v59  ;;  %v793_v10 = vmul.f32 %v834_v49, %v767_v25 }
  0xbb   :  { %v782_v11 = vmul.f32 %v832_v58, %v781_v50 }
  0xbc   :  { %v771_v18 = vmul.f32 0.5, %v770_v43  ;;  %v794_v39 = vmul.f32 %v834_v49, %v793_v10 }
  0xbd   :  { %v783_v52 = vmul.f32 0.5, %v782_v11 }
  0xbe   :  { %v772_v4 = vsub.f32 1.5, %v771_v18  ;;  %v795_v0 = vmul.f32 0.5, %v794_v39 }
  0xbf   :  { %v784_v60 = vsub.f32 1.5, %v783_v52 }
  0xc0   :  { %v773_v44 = vmul.f32 %v830_v42, %v772_v4  ;;  %v796_v23 = vsub.f32 1.5, %v795_v0 }
  0xc1   :  { %v785_v51 = vmul.f32 %v832_v58, %v784_v60 }
  0xc2   :  { %v774_v56 = vmul.f32 %v773_v44, %v765_v22  ;;  %v797_v9 = vmul.f32 %v834_v49, %v796_v23 }
  0xc3   :  { %v786_v16 = vmul.f32 %v785_v51, %v766_v61 }
  0xc4   :  { %v776_v48 = vsel %vm775_vm7, %v765_v22, %v774_v56  ;;  %v798_v3 = vmul.f32 %v797_v9, %v767_v25 }
  0xc5   :  { %v779_v21 = vsel %vm777_vm8, %v778_v19, %v776_v48  ;;  %v788_v36 = vsel %vm787_vm9, %v766_v61, %v786_v16 }
  0xc6   :  { %v791_v31 = vsel %vm789_vm10, %v790_v28, %v788_v36  ;;  %v800_v63 = vsel %vm799_vm11, %v767_v25, %v798_v3 }
  0xc7   :  { %v804_v47 = vadd.f32 %v791_v31, %v779_v21  ;;  %v803_v24 = vsel %vm801_vm12, %v802_v29, %v800_v63 }
  0xc9   :  { %v805_v53 = vadd.f32 %v804_v47, %v803_v24 }
  0xcb   :  { %v806_v26 = vmul.f32 0.33333334, %v805_v53 }
  0xcd   :  { %807 = vst [vmem:[#allocation5] sm:$0x1] %v806_v26 }
  0xce   :  { %818 = dma.vmem_to_hbm [thread:$0]  %s814_s13, 16, %s816_s16, [#allocation4]  }
  0xcf   :  { %885 = dma.done.wait [#allocation4], 16  }
  0xd0   :  { %886 = vsyncadd [#allocation4], 4294967280 }
  0xd1   :  { %823 = vsyncpa [#allocation3], 1 }
  0xd2   :  { %824 = vsyncpa [#allocation4], 1 }

</bundles_post_ra>
